<compile_context>
chip_gen: v7x
topology: tpu7x:2x2x1
jax: 0.10.0
libtpu: 0.0.40
codegen_flags: <defaults>
</compile_context>

<pallas_src>
import functools

import jax
import jax.numpy as jnp
import numpy as np
from jax.experimental import pallas as pl
from jax.experimental.pallas import tpu as pltpu


def _colornet_kernel(pitch, Ppad, M,
                     strength_ref, x_ref, xlut_ref, mask_ref,
                     w1_ref, b1_ref, w2_ref, b2_ref, w3_ref, b3_ref,
                     out_ref, feat_ref, patch_ref):
    """One batch element per grid step.

    feat_ref : VMEM (32, 2*M + Ppad) bf16 -- planar feature slab with M-lane
               margins so every 3x3 tap is a static in-bounds lane shift.
    patch_ref: VMEM (288, Ppad) bf16 -- im2col patch (9 taps x cin rows).
    """
    # 3x3 tap offsets in the row-major flattened (H+2, pitch) padded image.
    offsets = tuple((dy - 1) * pitch + (dx - 1)
                    for dy in range(3) for dx in range(3))

    # Zero only the margin columns (interior correctness never reads them; the
    # non-interior conv outputs are re-masked).  Done every step so it stays
    # valid under megacore "parallel" sharding and future spatial tiling.
    zeros_m = jnp.zeros((feat_ref.shape[0], M), feat_ref.dtype)
    feat_ref[:, 0:M] = zeros_m
    feat_ref[:, M + Ppad:M + Ppad + M] = zeros_m

    interior = mask_ref[...] > 0.5                      # (1, Ppad) bool

    def conv3x3(cin, w_ref, b_ref):
        # feat_ref[0:cin, M:M+Ppad] holds the conv input (zero pad border /
        # zero tail).  Build the (9*cin, Ppad) bf16 patch from 9 lane-shifted
        # copies, then a single bf16 MXU matmul against the (cout, 9*cin)
        # weights with f32 accumulation.
        for t, off in enumerate(offsets):
            patch_ref[t * cin:(t + 1) * cin, :] = (
                feat_ref[0:cin, M + off:M + off + Ppad])
        return jnp.dot(w_ref[...], patch_ref[0:9 * cin, :],
                       preferred_element_type=jnp.float32) + b_ref[...]

    # conv1 (8->32; input channels 6,7 are zero alignment padding)
    # + folded BN1 + ReLU, masked back to the image interior.
    feat_ref[0:8, M:M + Ppad] = x_ref[0]
    y = conv3x3(8, w1_ref, b1_ref)
    y = jnp.where(interior, jnp.maximum(y, 0.0), 0.0)

    # conv2 (32->32) + folded BN2 + ReLU.
    feat_ref[0:32, M:M + Ppad] = y.astype(jnp.bfloat16)
    y = conv3x3(32, w2_ref, b2_ref)
    y = jnp.where(interior, jnp.maximum(y, 0.0), 0.0)

    # conv3 (32->3) -> tanh residual, blend with f32 x_lut, clamp to [0, 1].
    feat_ref[0:32, M:M + Ppad] = y.astype(jnp.bfloat16)
    r = jnp.tanh(conv3x3(32, w3_ref, b3_ref))           # (3, Ppad) f32
    strength = jnp.clip(strength_ref[0], 0.05, 0.4)
    out_ref[0] = jnp.clip(xlut_ref[0] + strength * r, 0.0, 1.0)


def init_params(key):
    """Raw parameters mirroring the PyTorch module (conv weights in HWIO)."""
    k1, k2, k3 = jax.random.split(key, 3)
    w1 = jax.random.normal(k1, (3, 3, 6, 32), jnp.float32) * 0.10
    b1 = jnp.linspace(-0.05, 0.05, 32, dtype=jnp.float32)
    w2 = jax.random.normal(k2, (3, 3, 32, 32), jnp.float32) * 0.05
    b2 = jnp.linspace(-0.02, 0.02, 32, dtype=jnp.float32)
    w3 = jax.random.normal(k3, (3, 3, 32, 3), jnp.float32) * 0.05
    b3 = jnp.linspace(-0.01, 0.01, 3, dtype=jnp.float32)
    ones = jnp.ones((32,), jnp.float32)
    zeros = jnp.zeros((32,), jnp.float32)
    # BatchNorm2d inference-mode stats: (gamma, beta, running_mean, running_var)
    return {"w1": w1, "b1": b1, "bn1": (ones, zeros, zeros, ones),
            "w2": w2, "b2": b2, "bn2": (ones, zeros, zeros, ones),
            "w3": w3, "b3": b3,
            "strength": jnp.array([0.2], jnp.float32)}


def fold_params(p):
    """Fold BN into the conv weights/bias, reshape to (cout, 9*cin) im2col form
    (tap-major, channel-minor) and cast matmul weights to bfloat16."""
    eps = 1e-5

    def im2col_weight(w_hwio, cin_pad=None):
        if cin_pad is not None:
            w_hwio = jnp.pad(w_hwio, ((0, 0), (0, 0),
                                      (0, cin_pad - w_hwio.shape[2]), (0, 0)))
        cout = w_hwio.shape[-1]
        return jnp.transpose(w_hwio, (3, 0, 1, 2)).reshape(cout, -1)

    def fold_bn(w2d, b, bn):
        gamma, beta, mean, var = bn
        s = gamma / jnp.sqrt(var + eps)
        w_folded = (w2d * s[:, None]).astype(jnp.bfloat16)
        bias = (beta + (b - mean) * s)[:, None].astype(jnp.float32)
        return w_folded, bias

    w1, b1 = fold_bn(im2col_weight(p["w1"], cin_pad=8), p["b1"], p["bn1"])
    w2, b2 = fold_bn(im2col_weight(p["w2"]), p["b2"], p["bn2"])
    w3 = im2col_weight(p["w3"]).astype(jnp.bfloat16)
    b3 = p["b3"][:, None].astype(jnp.float32)
    return {"w1": w1, "b1": b1, "w2": w2, "b2": b2, "w3": w3, "b3": b3,
            "strength": p["strength"]}


def _vmem_limit_bytes():
    """Generation-aware VMEM budget: ~56 MiB on v7x, up to 100 MiB on v5e/v6e."""
    cap = None
    try:
        cap = getattr(pltpu.get_tpu_info(), "vmem_capacity_bytes", None)
    except Exception:
        cap = None
    if not cap:
        cap = 128 * 1024 * 1024
    return int(min(int(cap) - 8 * 1024 * 1024, 100 * 1024 * 1024))


@jax.jit
def lut_aware_colornet(x_original, x_lut, kp):
    """x_original, x_lut: (N, 3, H, W) float32 (NCHW, PyTorch convention)."""
    N, C, H, W = x_original.shape
    assert C == 3
    Hp, Wp = H + 2, W + 2
    # 128-aligned row pitch for large images -> lane-aligned tap shifts; keep
    # the natural pitch for small images to avoid padding blow-up.
    pitch = Wp if Wp < 128 else ((Wp + 127) // 128) * 128
    P = Hp * pitch
    Ppad = ((P + 127) // 128) * 128            # lane-dense flattened length
    M = ((pitch + 1 + 127) // 128) * 128       # tap-shift margin (128-aligned)
    col_pad = pitch - Wp + 1                   # right spatial pad in columns

    # bf16 conv-input slab: channels 0-2 = x_original, 3-5 = x_lut, 6-7 zero
    # alignment padding, flattened over the zero-padded (H+2, pitch) grid and
    # tail-padded to Ppad lanes.  NCHW memory order -> only pads, no transposes.
    x_comb = jnp.concatenate([x_original, x_lut], axis=1).astype(jnp.bfloat16)
    x_slab = jnp.pad(x_comb, ((0, 0), (0, 2), (1, 1), (1, col_pad)))
    x_slab = jnp.pad(x_slab.reshape(N, 8, P), ((0, 0), (0, 0), (0, Ppad - P)))

    # f32 x_lut in the same flat layout for the high-fidelity final blend.
    xlut = jnp.pad(x_lut.astype(jnp.float32),
                   ((0, 0), (0, 0), (1, 1), (1, col_pad)))
    xlut = jnp.pad(xlut.reshape(N, 3, P), ((0, 0), (0, 0), (0, Ppad - P)))

    # Interior mask: 1 on the original HxW pixels, 0 on pad border / lane tail.
    m2d = np.zeros((Hp, pitch), np.float32)
    m2d[1:H + 1, 1:W + 1] = 1.0
    mask_np = np.zeros((1, Ppad), np.float32)
    mask_np[0, :P] = m2d.reshape(-1)
    mask = jnp.asarray(mask_np)

    kernel = functools.partial(_colornet_kernel, pitch, Ppad, M)
    out_flat = pl.pallas_call(
        kernel,
        out_shape=jax.ShapeDtypeStruct((N, 3, Ppad), jnp.float32),
        grid=(N,),
        in_specs=[
            pl.BlockSpec(memory_space=pltpu.MemorySpace.SMEM),        # strength
            pl.BlockSpec((1, 8, Ppad), lambda n: (n, 0, 0)),          # bf16 input slab
            pl.BlockSpec((1, 3, Ppad), lambda n: (n, 0, 0)),          # f32 x_lut (blend)
            pl.BlockSpec((1, Ppad), lambda n: (0, 0)),                # interior mask
            pl.BlockSpec(kp["w1"].shape, lambda n: (0, 0)),           # w1 (bf16, BN folded)
            pl.BlockSpec(kp["b1"].shape, lambda n: (0, 0)),           # b1
            pl.BlockSpec(kp["w2"].shape, lambda n: (0, 0)),           # w2 (bf16, BN folded)
            pl.BlockSpec(kp["b2"].shape, lambda n: (0, 0)),           # b2
            pl.BlockSpec(kp["w3"].shape, lambda n: (0, 0)),           # w3 (bf16)
            pl.BlockSpec(kp["b3"].shape, lambda n: (0, 0)),           # b3
        ],
        out_specs=pl.BlockSpec((1, 3, Ppad), lambda n: (n, 0, 0)),
        scratch_shapes=[
            pltpu.VMEM((32, Ppad + 2 * M), jnp.bfloat16),  # feature slab + margins
            pltpu.VMEM((288, Ppad), jnp.bfloat16),         # im2col patch
        ],
        compiler_params=pltpu.CompilerParams(
            dimension_semantics=("parallel",),
            vmem_limit_bytes=_vmem_limit_bytes()),
    )(kp["strength"], x_slab, xlut, mask,
      kp["w1"], kp["b1"], kp["w2"], kp["b2"], kp["w3"], kp["b3"])

    # Drop the pad border / lane tail: flat planar -> NCHW interior.
    out = out_flat[:, :, :P].reshape(N, 3, Hp, pitch)[:, :, 1:H + 1, 1:W + 1]
    return out


def lut_aware_colornet_ref(x_original, x_lut, p):
    """Pure-JAX reference (XLA conv, f32) for correctness checking."""
    eps = 1e-5

    def conv(x_nhwc, w):
        return jax.lax.conv_general_dilated(
            x_nhwc, w, window_strides=(1, 1), padding="SAME",
            dimension_numbers=("NHWC", "HWIO", "NHWC"))

    def bn(x, b, stats):
        gamma, beta, mean, var = stats
        return (x + b - mean) * (gamma / jnp.sqrt(var + eps)) + beta

    x = jnp.transpose(jnp.concatenate([x_original, x_lut], axis=1), (0, 2, 3, 1))
    xl = jnp.transpose(x_lut, (0, 2, 3, 1))
    y = jax.nn.relu(bn(conv(x, p["w1"]), p["b1"], p["bn1"]))
    y = jax.nn.relu(bn(conv(y, p["w2"]), p["b2"], p["bn2"]))
    r = jnp.tanh(conv(y, p["w3"]) + p["b3"])
    strength = jnp.clip(p["strength"][0], 0.05, 0.4)
    out = jnp.clip(xl + strength * r, 0.0, 1.0)
    return jnp.transpose(out, (0, 3, 1, 2))


if __name__ == "__main__":
    key = jax.random.PRNGKey(0)
    kx, kl, kp = jax.random.split(key, 3)
    N, H, W = 2, 16, 16
    x_original = jax.random.uniform(kx, (N, 3, H, W), dtype=jnp.float32)
    x_lut = jax.random.uniform(kl, (N, 3, H, W), dtype=jnp.float32)

    params = init_params(kp)
    kparams = fold_params(params)

    out = lut_aware_colornet(x_original, x_lut, kparams)
    out = jax.block_until_ready(out)
    assert out.shape == (N, 3, H, W)

    ref = lut_aware_colornet_ref(x_original, x_lut, params)
    np.testing.assert_allclose(np.asarray(out), np.asarray(ref),
                               atol=1e-2, rtol=1e-2)  # bf16 matmul path
    print("KERNEL_OK")
</pallas_src>

<mosaic_0001>
module attributes {stable_mosaic.version = 11 : i64} {
  func.func @_colornet_kernel(%arg0: i32, %arg1: memref<1xf32, #tpu.memory_space<smem>>, %arg2: memref<1x8x384xbf16, #tpu.memory_space<vmem>>, %arg3: memref<1x3x384xf32, #tpu.memory_space<vmem>>, %arg4: memref<1x384xf32, #tpu.memory_space<vmem>>, %arg5: memref<32x72xbf16, #tpu.memory_space<vmem>>, %arg6: memref<32x1xf32, #tpu.memory_space<vmem>>, %arg7: memref<32x288xbf16, #tpu.memory_space<vmem>>, %arg8: memref<32x1xf32, #tpu.memory_space<vmem>>, %arg9: memref<3x288xbf16, #tpu.memory_space<vmem>>, %arg10: memref<3x1xf32, #tpu.memory_space<vmem>>, %arg11: memref<1x3x384xf32, #tpu.memory_space<vmem>>, %arg12: memref<32x640xbf16, #tpu.memory_space<vmem>>, %arg13: memref<288x384xbf16, #tpu.memory_space<vmem>>) attributes {dimension_semantics = [#tpu.dimension_semantics<parallel>], iteration_bounds = array<i64: 2>, scalar_prefetch = 0 : i64, scratch_operands = 2 : i64, tpu.core_type = #tpu.core_type<tc>, window_params = [{transform_indices = @transform_0, window_bounds = array<i64: 1>}, {transform_indices = @transform_1, window_bounds = array<i64: 1, 8, 384>}, {transform_indices = @transform_2, window_bounds = array<i64: 1, 3, 384>}, {pipeline_mode = #tpu.pipeline_mode<synchronous>, transform_indices = @transform_3, window_bounds = array<i64: 1, 384>}, {pipeline_mode = #tpu.pipeline_mode<synchronous>, transform_indices = @transform_4, window_bounds = array<i64: 32, 72>}, {pipeline_mode = #tpu.pipeline_mode<synchronous>, transform_indices = @transform_5, window_bounds = array<i64: 32, 1>}, {pipeline_mode = #tpu.pipeline_mode<synchronous>, transform_indices = @transform_6, window_bounds = array<i64: 32, 288>}, {pipeline_mode = #tpu.pipeline_mode<synchronous>, transform_indices = @transform_7, window_bounds = array<i64: 32, 1>}, {pipeline_mode = #tpu.pipeline_mode<synchronous>, transform_indices = @transform_8, window_bounds = array<i64: 3, 288>}, {pipeline_mode = #tpu.pipeline_mode<synchronous>, transform_indices = @transform_9, window_bounds = array<i64: 3, 1>}, {transform_indices = @transform_10, window_bounds = array<i64: 1, 3, 384>}]} {
    %cst = arith.constant 0.000000e+00 : bf16
    %0 = vector.broadcast %cst : bf16 to vector<32x128xbf16>
    %c0 = arith.constant 0 : index
    %c0_0 = arith.constant 0 : index
    %1 = vector.load %arg12[%c0, %c0_0] : memref<32x640xbf16, #tpu.memory_space<vmem>>, vector<32x128xbf16>
    tpu.vector_store %arg12[%c0, %c0_0], %0 {strides = array<i32>} : memref<32x640xbf16, #tpu.memory_space<vmem>>, vector<32x128xbf16>,
    %c0_1 = arith.constant 0 : index
    %c512 = arith.constant 512 : index
    %2 = vector.load %arg12[%c0_1, %c512] : memref<32x640xbf16, #tpu.memory_space<vmem>>, vector<32x128xbf16>
    tpu.vector_store %arg12[%c0_1, %c512], %0 {strides = array<i32>} : memref<32x640xbf16, #tpu.memory_space<vmem>>, vector<32x128xbf16>,
    %c0_2 = arith.constant 0 : index
    %c0_3 = arith.constant 0 : index
    %3 = vector.load %arg4[%c0_2, %c0_3] : memref<1x384xf32, #tpu.memory_space<vmem>>, vector<1x384xf32>
    %cst_4 = arith.constant 5.000000e-01 : f32
    %4 = vector.broadcast %cst_4 : f32 to vector<1x384xf32>
    %5 = arith.cmpf ogt, %3, %4 : vector<1x384xf32>
    %c0_5 = arith.constant 0 : index
    %c0_6 = arith.constant 0 : index
    %c0_7 = arith.constant 0 : index
    %6 = vector.load %arg2[%c0_5, %c0_6, %c0_7] : memref<1x8x384xbf16, #tpu.memory_space<vmem>>, vector<1x8x384xbf16>
    %7 = vector.shape_cast %6 : vector<1x8x384xbf16> to vector<8x384xbf16>
    %c0_8 = arith.constant 0 : index
    %c128 = arith.constant 128 : index
    %8 = vector.load %arg12[%c0_8, %c128] : memref<32x640xbf16, #tpu.memory_space<vmem>>, vector<8x384xbf16>
    tpu.vector_store %arg12[%c0_8, %c128], %7 {strides = array<i32>} : memref<32x640xbf16, #tpu.memory_space<vmem>>, vector<8x384xbf16>,
    %c0_9 = arith.constant 0 : index
    %c109 = arith.constant 109 : index
    %9 = vector.load %arg12[%c0_9, %c109] : memref<32x640xbf16, #tpu.memory_space<vmem>>, vector<8x384xbf16>
    %c0_10 = arith.constant 0 : index
    %c0_11 = arith.constant 0 : index
    %10 = vector.load %arg13[%c0_10, %c0_11] : memref<288x384xbf16, #tpu.memory_space<vmem>>, vector<8x384xbf16>
    tpu.vector_store %arg13[%c0_10, %c0_11], %9 {strides = array<i32>} : memref<288x384xbf16, #tpu.memory_space<vmem>>, vector<8x384xbf16>,
    %c0_12 = arith.constant 0 : index
    %c110 = arith.constant 110 : index
    %11 = vector.load %arg12[%c0_12, %c110] : memref<32x640xbf16, #tpu.memory_space<vmem>>, vector<8x384xbf16>
    %c8 = arith.constant 8 : index
    %c0_13 = arith.constant 0 : index
    %12 = vector.load %arg13[%c8, %c0_13] : memref<288x384xbf16, #tpu.memory_space<vmem>>, vector<8x384xbf16>
    tpu.vector_store %arg13[%c8, %c0_13], %11 {strides = array<i32>} : memref<288x384xbf16, #tpu.memory_space<vmem>>, vector<8x384xbf16>,
    %c0_14 = arith.constant 0 : index
    %c111 = arith.constant 111 : index
    %13 = vector.load %arg12[%c0_14, %c111] : memref<32x640xbf16, #tpu.memory_space<vmem>>, vector<8x384xbf16>
    %c16 = arith.constant 16 : index
    %c0_15 = arith.constant 0 : index
    %14 = vector.load %arg13[%c16, %c0_15] : memref<288x384xbf16, #tpu.memory_space<vmem>>, vector<8x384xbf16>
    tpu.vector_store %arg13[%c16, %c0_15], %13 {strides = array<i32>} : memref<288x384xbf16, #tpu.memory_space<vmem>>, vector<8x384xbf16>,
    %c0_16 = arith.constant 0 : index
    %c127 = arith.constant 127 : index
    %15 = vector.load %arg12[%c0_16, %c127] : memref<32x640xbf16, #tpu.memory_space<vmem>>, vector<8x384xbf16>
    %c24 = arith.constant 24 : index
    %c0_17 = arith.constant 0 : index
    %16 = vector.load %arg13[%c24, %c0_17] : memref<288x384xbf16, #tpu.memory_space<vmem>>, vector<8x384xbf16>
    tpu.vector_store %arg13[%c24, %c0_17], %15 {strides = array<i32>} : memref<288x384xbf16, #tpu.memory_space<vmem>>, vector<8x384xbf16>,
    %c0_18 = arith.constant 0 : index
    %c128_19 = arith.constant 128 : index
    %17 = vector.load %arg12[%c0_18, %c128_19] : memref<32x640xbf16, #tpu.memory_space<vmem>>, vector<8x384xbf16>
    %c32 = arith.constant 32 : index
    %c0_20 = arith.constant 0 : index
    %18 = vector.load %arg13[%c32, %c0_20] : memref<288x384xbf16, #tpu.memory_space<vmem>>, vector<8x384xbf16>
    tpu.vector_store %arg13[%c32, %c0_20], %17 {strides = array<i32>} : memref<288x384xbf16, #tpu.memory_space<vmem>>, vector<8x384xbf16>,
    %c0_21 = arith.constant 0 : index
    %c129 = arith.constant 129 : index
    %19 = vector.load %arg12[%c0_21, %c129] : memref<32x640xbf16, #tpu.memory_space<vmem>>, vector<8x384xbf16>
    %c40 = arith.constant 40 : index
    %c0_22 = arith.constant 0 : index
    %20 = vector.load %arg13[%c40, %c0_22] : memref<288x384xbf16, #tpu.memory_space<vmem>>, vector<8x384xbf16>
    tpu.vector_store %arg13[%c40, %c0_22], %19 {strides = array<i32>} : memref<288x384xbf16, #tpu.memory_space<vmem>>, vector<8x384xbf16>,
    %c0_23 = arith.constant 0 : index
    %c145 = arith.constant 145 : index
    %21 = vector.load %arg12[%c0_23, %c145] : memref<32x640xbf16, #tpu.memory_space<vmem>>, vector<8x384xbf16>
    %c48 = arith.constant 48 : index
    %c0_24 = arith.constant 0 : index
    %22 = vector.load %arg13[%c48, %c0_24] : memref<288x384xbf16, #tpu.memory_space<vmem>>, vector<8x384xbf16>
    tpu.vector_store %arg13[%c48, %c0_24], %21 {strides = array<i32>} : memref<288x384xbf16, #tpu.memory_space<vmem>>, vector<8x384xbf16>,
    %c0_25 = arith.constant 0 : index
    %c146 = arith.constant 146 : index
    %23 = vector.load %arg12[%c0_25, %c146] : memref<32x640xbf16, #tpu.memory_space<vmem>>, vector<8x384xbf16>
    %c56 = arith.constant 56 : index
    %c0_26 = arith.constant 0 : index
    %24 = vector.load %arg13[%c56, %c0_26] : memref<288x384xbf16, #tpu.memory_space<vmem>>, vector<8x384xbf16>
    tpu.vector_store %arg13[%c56, %c0_26], %23 {strides = array<i32>} : memref<288x384xbf16, #tpu.memory_space<vmem>>, vector<8x384xbf16>,
    %c0_27 = arith.constant 0 : index
    %c147 = arith.constant 147 : index
    %25 = vector.load %arg12[%c0_27, %c147] : memref<32x640xbf16, #tpu.memory_space<vmem>>, vector<8x384xbf16>
    %c64 = arith.constant 64 : index
    %c0_28 = arith.constant 0 : index
    %26 = vector.load %arg13[%c64, %c0_28] : memref<288x384xbf16, #tpu.memory_space<vmem>>, vector<8x384xbf16>
    tpu.vector_store %arg13[%c64, %c0_28], %25 {strides = array<i32>} : memref<288x384xbf16, #tpu.memory_space<vmem>>, vector<8x384xbf16>,
    %c0_29 = arith.constant 0 : index
    %c0_30 = arith.constant 0 : index
    %27 = vector.load %arg5[%c0_29, %c0_30] : memref<32x72xbf16, #tpu.memory_space<vmem>>, vector<32x72xbf16>
    %c0_31 = arith.constant 0 : index
    %c0_32 = arith.constant 0 : index
    %28 = vector.load %arg13[%c0_31, %c0_32] : memref<288x384xbf16, #tpu.memory_space<vmem>>, vector<72x384xbf16>
    %cst_33 = arith.constant dense<0.000000e+00> : vector<32x384xf32>
    %29 = tpu.matmul %27, %28, %cst_33 {dimension_numbers = #tpu.dot_dimension_numbers<[1], [0], [0], [1], [0, 0, 1, 1], [], []>} : vector<32x72xbf16>, vector<72x384xbf16>, vector<32x384xf32> -> vector<32x384xf32>
    %c0_34 = arith.constant 0 : index
    %c0_35 = arith.constant 0 : index
    %30 = vector.load %arg6[%c0_34, %c0_35] : memref<32x1xf32, #tpu.memory_space<vmem>>, vector<32x1xf32>
    %31 = vector.broadcast %30 : vector<32x1xf32> to vector<32x384xf32>
    %32 = arith.addf %29, %31 : vector<32x384xf32>
    %cst_36 = arith.constant 0.000000e+00 : f32
    %33 = vector.broadcast %cst_36 : f32 to vector<32x384xf32>
    %34 = arith.maximumf %32, %33 : vector<32x384xf32>
    %cst_37 = arith.constant 0.000000e+00 : f32
    %35 = vector.shape_cast %5 : vector<1x384xi1> to vector<1x384xi1>
    %36 = vector.broadcast %35 : vector<1x384xi1> to vector<32x384xi1>
    %37 = vector.broadcast %cst_37 : f32 to vector<32x384xf32>
    %38 = arith.select %36, %34, %37 : vector<32x384xi1>, vector<32x384xf32>
    %39 = arith.truncf %38 : vector<32x384xf32> to vector<32x384xbf16>
    %c0_38 = arith.constant 0 : index
    %c128_39 = arith.constant 128 : index
    %40 = vector.load %arg12[%c0_38, %c128_39] : memref<32x640xbf16, #tpu.memory_space<vmem>>, vector<32x384xbf16>
    tpu.vector_store %arg12[%c0_38, %c128_39], %39 {strides = array<i32>} : memref<32x640xbf16, #tpu.memory_space<vmem>>, vector<32x384xbf16>,
    %c0_40 = arith.constant 0 : index
    %c109_41 = arith.constant 109 : index
    %41 = vector.load %arg12[%c0_40, %c109_41] : memref<32x640xbf16, #tpu.memory_space<vmem>>, vector<32x384xbf16>
    %c0_42 = arith.constant 0 : index
    %c0_43 = arith.constant 0 : index
    %42 = vector.load %arg13[%c0_42, %c0_43] : memref<288x384xbf16, #tpu.memory_space<vmem>>, vector<32x384xbf16>
    tpu.vector_store %arg13[%c0_42, %c0_43], %41 {strides = array<i32>} : memref<288x384xbf16, #tpu.memory_space<vmem>>, vector<32x384xbf16>,
    %c0_44 = arith.constant 0 : index
    %c110_45 = arith.constant 110 : index
    %43 = vector.load %arg12[%c0_44, %c110_45] : memref<32x640xbf16, #tpu.memory_space<vmem>>, vector<32x384xbf16>
    %c32_46 = arith.constant 32 : index
    %c0_47 = arith.constant 0 : index
    %44 = vector.load %arg13[%c32_46, %c0_47] : memref<288x384xbf16, #tpu.memory_space<vmem>>, vector<32x384xbf16>
    tpu.vector_store %arg13[%c32_46, %c0_47], %43 {strides = array<i32>} : memref<288x384xbf16, #tpu.memory_space<vmem>>, vector<32x384xbf16>,
    %c0_48 = arith.constant 0 : index
    %c111_49 = arith.constant 111 : index
    %45 = vector.load %arg12[%c0_48, %c111_49] : memref<32x640xbf16, #tpu.memory_space<vmem>>, vector<32x384xbf16>
    %c64_50 = arith.constant 64 : index
    %c0_51 = arith.constant 0 : index
    %46 = vector.load %arg13[%c64_50, %c0_51] : memref<288x384xbf16, #tpu.memory_space<vmem>>, vector<32x384xbf16>
    tpu.vector_store %arg13[%c64_50, %c0_51], %45 {strides = array<i32>} : memref<288x384xbf16, #tpu.memory_space<vmem>>, vector<32x384xbf16>,
    %c0_52 = arith.constant 0 : index
    %c127_53 = arith.constant 127 : index
    %47 = vector.load %arg12[%c0_52, %c127_53] : memref<32x640xbf16, #tpu.memory_space<vmem>>, vector<32x384xbf16>
    %c96 = arith.constant 96 : index
    %c0_54 = arith.constant 0 : index
    %48 = vector.load %arg13[%c96, %c0_54] : memref<288x384xbf16, #tpu.memory_space<vmem>>, vector<32x384xbf16>
    tpu.vector_store %arg13[%c96, %c0_54], %47 {strides = array<i32>} : memref<288x384xbf16, #tpu.memory_space<vmem>>, vector<32x384xbf16>,
    %c0_55 = arith.constant 0 : index
    %c128_56 = arith.constant 128 : index
    %49 = vector.load %arg12[%c0_55, %c128_56] : memref<32x640xbf16, #tpu.memory_space<vmem>>, vector<32x384xbf16>
    %c128_57 = arith.constant 128 : index
    %c0_58 = arith.constant 0 : index
    %50 = vector.load %arg13[%c128_57, %c0_58] : memref<288x384xbf16, #tpu.memory_space<vmem>>, vector<32x384xbf16>
    tpu.vector_store %arg13[%c128_57, %c0_58], %49 {strides = array<i32>} : memref<288x384xbf16, #tpu.memory_space<vmem>>, vector<32x384xbf16>,
    %c0_59 = arith.constant 0 : index
    %c129_60 = arith.constant 129 : index
    %51 = vector.load %arg12[%c0_59, %c129_60] : memref<32x640xbf16, #tpu.memory_space<vmem>>, vector<32x384xbf16>
    %c160 = arith.constant 160 : index
    %c0_61 = arith.constant 0 : index
    %52 = vector.load %arg13[%c160, %c0_61] : memref<288x384xbf16, #tpu.memory_space<vmem>>, vector<32x384xbf16>
    tpu.vector_store %arg13[%c160, %c0_61], %51 {strides = array<i32>} : memref<288x384xbf16, #tpu.memory_space<vmem>>, vector<32x384xbf16>,
    %c0_62 = arith.constant 0 : index
    %c145_63 = arith.constant 145 : index
    %53 = vector.load %arg12[%c0_62, %c145_63] : memref<32x640xbf16, #tpu.memory_space<vmem>>, vector<32x384xbf16>
    %c192 = arith.constant 192 : index
    %c0_64 = arith.constant 0 : index
    %54 = vector.load %arg13[%c192, %c0_64] : memref<288x384xbf16, #tpu.memory_space<vmem>>, vector<32x384xbf16>
    tpu.vector_store %arg13[%c192, %c0_64], %53 {strides = array<i32>} : memref<288x384xbf16, #tpu.memory_space<vmem>>, vector<32x384xbf16>,
    %c0_65 = arith.constant 0 : index
    %c146_66 = arith.constant 146 : index
    %55 = vector.load %arg12[%c0_65, %c146_66] : memref<32x640xbf16, #tpu.memory_space<vmem>>, vector<32x384xbf16>
    %c224 = arith.constant 224 : index
    %c0_67 = arith.constant 0 : index
    %56 = vector.load %arg13[%c224, %c0_67] : memref<288x384xbf16, #tpu.memory_space<vmem>>, vector<32x384xbf16>
    tpu.vector_store %arg13[%c224, %c0_67], %55 {strides = array<i32>} : memref<288x384xbf16, #tpu.memory_space<vmem>>, vector<32x384xbf16>,
    %c0_68 = arith.constant 0 : index
    %c147_69 = arith.constant 147 : index
    %57 = vector.load %arg12[%c0_68, %c147_69] : memref<32x640xbf16, #tpu.memory_space<vmem>>, vector<32x384xbf16>
    %c256 = arith.constant 256 : index
    %c0_70 = arith.constant 0 : index
    %58 = vector.load %arg13[%c256, %c0_70] : memref<288x384xbf16, #tpu.memory_space<vmem>>, vector<32x384xbf16>
    tpu.vector_store %arg13[%c256, %c0_70], %57 {strides = array<i32>} : memref<288x384xbf16, #tpu.memory_space<vmem>>, vector<32x384xbf16>,
    %c0_71 = arith.constant 0 : index
    %c0_72 = arith.constant 0 : index
    %59 = vector.load %arg7[%c0_71, %c0_72] : memref<32x288xbf16, #tpu.memory_space<vmem>>, vector<32x288xbf16>
    %c0_73 = arith.constant 0 : index
    %c0_74 = arith.constant 0 : index
    %60 = vector.load %arg13[%c0_73, %c0_74] : memref<288x384xbf16, #tpu.memory_space<vmem>>, vector<288x384xbf16>
    %cst_75 = arith.constant dense<0.000000e+00> : vector<32x384xf32>
    %61 = tpu.matmul %59, %60, %cst_75 {dimension_numbers = #tpu.dot_dimension_numbers<[1], [0], [0], [1], [0, 0, 1, 1], [], []>} : vector<32x288xbf16>, vector<288x384xbf16>, vector<32x384xf32> -> vector<32x384xf32>
    %c0_76 = arith.constant 0 : index
    %c0_77 = arith.constant 0 : index
    %62 = vector.load %arg8[%c0_76, %c0_77] : memref<32x1xf32, #tpu.memory_space<vmem>>, vector<32x1xf32>
    %63 = vector.broadcast %62 : vector<32x1xf32> to vector<32x384xf32>
    %64 = arith.addf %61, %63 : vector<32x384xf32>
    %cst_78 = arith.constant 0.000000e+00 : f32
    %65 = vector.broadcast %cst_78 : f32 to vector<32x384xf32>
    %66 = arith.maximumf %64, %65 : vector<32x384xf32>
    %cst_79 = arith.constant 0.000000e+00 : f32
    %67 = vector.shape_cast %5 : vector<1x384xi1> to vector<1x384xi1>
    %68 = vector.broadcast %67 : vector<1x384xi1> to vector<32x384xi1>
    %69 = vector.broadcast %cst_79 : f32 to vector<32x384xf32>
    %70 = arith.select %68, %66, %69 : vector<32x384xi1>, vector<32x384xf32>
    %71 = arith.truncf %70 : vector<32x384xf32> to vector<32x384xbf16>
    %c0_80 = arith.constant 0 : index
    %c128_81 = arith.constant 128 : index
    %72 = vector.load %arg12[%c0_80, %c128_81] : memref<32x640xbf16, #tpu.memory_space<vmem>>, vector<32x384xbf16>
    tpu.vector_store %arg12[%c0_80, %c128_81], %71 {strides = array<i32>} : memref<32x640xbf16, #tpu.memory_space<vmem>>, vector<32x384xbf16>,
    %c0_82 = arith.constant 0 : index
    %c109_83 = arith.constant 109 : index
    %73 = vector.load %arg12[%c0_82, %c109_83] : memref<32x640xbf16, #tpu.memory_space<vmem>>, vector<32x384xbf16>
    %c0_84 = arith.constant 0 : index
    %c0_85 = arith.constant 0 : index
    %74 = vector.load %arg13[%c0_84, %c0_85] : memref<288x384xbf16, #tpu.memory_space<vmem>>, vector<32x384xbf16>
    tpu.vector_store %arg13[%c0_84, %c0_85], %73 {strides = array<i32>} : memref<288x384xbf16, #tpu.memory_space<vmem>>, vector<32x384xbf16>,
    %c0_86 = arith.constant 0 : index
    %c110_87 = arith.constant 110 : index
    %75 = vector.load %arg12[%c0_86, %c110_87] : memref<32x640xbf16, #tpu.memory_space<vmem>>, vector<32x384xbf16>
    %c32_88 = arith.constant 32 : index
    %c0_89 = arith.constant 0 : index
    %76 = vector.load %arg13[%c32_88, %c0_89] : memref<288x384xbf16, #tpu.memory_space<vmem>>, vector<32x384xbf16>
    tpu.vector_store %arg13[%c32_88, %c0_89], %75 {strides = array<i32>} : memref<288x384xbf16, #tpu.memory_space<vmem>>, vector<32x384xbf16>,
    %c0_90 = arith.constant 0 : index
    %c111_91 = arith.constant 111 : index
    %77 = vector.load %arg12[%c0_90, %c111_91] : memref<32x640xbf16, #tpu.memory_space<vmem>>, vector<32x384xbf16>
    %c64_92 = arith.constant 64 : index
    %c0_93 = arith.constant 0 : index
    %78 = vector.load %arg13[%c64_92, %c0_93] : memref<288x384xbf16, #tpu.memory_space<vmem>>, vector<32x384xbf16>
    tpu.vector_store %arg13[%c64_92, %c0_93], %77 {strides = array<i32>} : memref<288x384xbf16, #tpu.memory_space<vmem>>, vector<32x384xbf16>,
    %c0_94 = arith.constant 0 : index
    %c127_95 = arith.constant 127 : index
    %79 = vector.load %arg12[%c0_94, %c127_95] : memref<32x640xbf16, #tpu.memory_space<vmem>>, vector<32x384xbf16>
    %c96_96 = arith.constant 96 : index
    %c0_97 = arith.constant 0 : index
    %80 = vector.load %arg13[%c96_96, %c0_97] : memref<288x384xbf16, #tpu.memory_space<vmem>>, vector<32x384xbf16>
    tpu.vector_store %arg13[%c96_96, %c0_97], %79 {strides = array<i32>} : memref<288x384xbf16, #tpu.memory_space<vmem>>, vector<32x384xbf16>,
    %c0_98 = arith.constant 0 : index
    %c128_99 = arith.constant 128 : index
    %81 = vector.load %arg12[%c0_98, %c128_99] : memref<32x640xbf16, #tpu.memory_space<vmem>>, vector<32x384xbf16>
    %c128_100 = arith.constant 128 : index
    %c0_101 = arith.constant 0 : index
    %82 = vector.load %arg13[%c128_100, %c0_101] : memref<288x384xbf16, #tpu.memory_space<vmem>>, vector<32x384xbf16>
    tpu.vector_store %arg13[%c128_100, %c0_101], %81 {strides = array<i32>} : memref<288x384xbf16, #tpu.memory_space<vmem>>, vector<32x384xbf16>,
    %c0_102 = arith.constant 0 : index
    %c129_103 = arith.constant 129 : index
    %83 = vector.load %arg12[%c0_102, %c129_103] : memref<32x640xbf16, #tpu.memory_space<vmem>>, vector<32x384xbf16>
    %c160_104 = arith.constant 160 : index
    %c0_105 = arith.constant 0 : index
    %84 = vector.load %arg13[%c160_104, %c0_105] : memref<288x384xbf16, #tpu.memory_space<vmem>>, vector<32x384xbf16>
    tpu.vector_store %arg13[%c160_104, %c0_105], %83 {strides = array<i32>} : memref<288x384xbf16, #tpu.memory_space<vmem>>, vector<32x384xbf16>,
    %c0_106 = arith.constant 0 : index
    %c145_107 = arith.constant 145 : index
    %85 = vector.load %arg12[%c0_106, %c145_107] : memref<32x640xbf16, #tpu.memory_space<vmem>>, vector<32x384xbf16>
    %c192_108 = arith.constant 192 : index
    %c0_109 = arith.constant 0 : index
    %86 = vector.load %arg13[%c192_108, %c0_109] : memref<288x384xbf16, #tpu.memory_space<vmem>>, vector<32x384xbf16>
    tpu.vector_store %arg13[%c192_108, %c0_109], %85 {strides = array<i32>} : memref<288x384xbf16, #tpu.memory_space<vmem>>, vector<32x384xbf16>,
    %c0_110 = arith.constant 0 : index
    %c146_111 = arith.constant 146 : index
    %87 = vector.load %arg12[%c0_110, %c146_111] : memref<32x640xbf16, #tpu.memory_space<vmem>>, vector<32x384xbf16>
    %c224_112 = arith.constant 224 : index
    %c0_113 = arith.constant 0 : index
    %88 = vector.load %arg13[%c224_112, %c0_113] : memref<288x384xbf16, #tpu.memory_space<vmem>>, vector<32x384xbf16>
    tpu.vector_store %arg13[%c224_112, %c0_113], %87 {strides = array<i32>} : memref<288x384xbf16, #tpu.memory_space<vmem>>, vector<32x384xbf16>,
    %c0_114 = arith.constant 0 : index
    %c147_115 = arith.constant 147 : index
    %89 = vector.load %arg12[%c0_114, %c147_115] : memref<32x640xbf16, #tpu.memory_space<vmem>>, vector<32x384xbf16>
    %c256_116 = arith.constant 256 : index
    %c0_117 = arith.constant 0 : index
    %90 = vector.load %arg13[%c256_116, %c0_117] : memref<288x384xbf16, #tpu.memory_space<vmem>>, vector<32x384xbf16>
    tpu.vector_store %arg13[%c256_116, %c0_117], %89 {strides = array<i32>} : memref<288x384xbf16, #tpu.memory_space<vmem>>, vector<32x384xbf16>,
    %c0_118 = arith.constant 0 : index
    %c0_119 = arith.constant 0 : index
    %91 = vector.load %arg9[%c0_118, %c0_119] : memref<3x288xbf16, #tpu.memory_space<vmem>>, vector<3x288xbf16>
    %c0_120 = arith.constant 0 : index
    %c0_121 = arith.constant 0 : index
    %92 = vector.load %arg13[%c0_120, %c0_121] : memref<288x384xbf16, #tpu.memory_space<vmem>>, vector<288x384xbf16>
    %cst_122 = arith.constant dense<0.000000e+00> : vector<3x384xf32>
    %93 = tpu.matmul %91, %92, %cst_122 {dimension_numbers = #tpu.dot_dimension_numbers<[1], [0], [0], [1], [0, 0, 1, 1], [], []>} : vector<3x288xbf16>, vector<288x384xbf16>, vector<3x384xf32> -> vector<3x384xf32>
    %c0_123 = arith.constant 0 : index
    %c0_124 = arith.constant 0 : index
    %94 = vector.load %arg10[%c0_123, %c0_124] : memref<3x1xf32, #tpu.memory_space<vmem>>, vector<3x1xf32>
    %95 = vector.broadcast %94 : vector<3x1xf32> to vector<3x384xf32>
    %96 = arith.addf %93, %95 : vector<3x384xf32>
    %97 = math.tanh %96 : vector<3x384xf32>
    %c0_125 = arith.constant 0 : index
    %98 = memref.load %arg1[%c0_125] : memref<1xf32, #tpu.memory_space<smem>>
    %cst_126 = arith.constant 5.000000e-02 : f32
    %cst_127 = arith.constant 4.000000e-01 : f32
    %99 = arith.maximumf %cst_126, %98 : f32
    %100 = arith.minimumf %cst_127, %99 : f32
    %c0_128 = arith.constant 0 : index
    %c0_129 = arith.constant 0 : index
    %c0_130 = arith.constant 0 : index
    %101 = vector.load %arg3[%c0_128, %c0_129, %c0_130] : memref<1x3x384xf32, #tpu.memory_space<vmem>>, vector<1x3x384xf32>
    %102 = vector.shape_cast %101 : vector<1x3x384xf32> to vector<3x384xf32>
    %103 = vector.broadcast %100 : f32 to vector<3x384xf32>
    %104 = arith.mulf %103, %97 : vector<3x384xf32>
    %105 = arith.addf %102, %104 : vector<3x384xf32>
    %cst_131 = arith.constant 0.000000e+00 : f32
    %cst_132 = arith.constant 1.000000e+00 : f32
    %106 = vector.broadcast %cst_131 : f32 to vector<3x384xf32>
    %107 = arith.maximumf %106, %105 : vector<3x384xf32>
    %108 = vector.broadcast %cst_132 : f32 to vector<3x384xf32>
    %109 = arith.minimumf %108, %107 : vector<3x384xf32>
    %c0_133 = arith.constant 0 : index
    %c0_134 = arith.constant 0 : index
    %c0_135 = arith.constant 0 : index
    %110 = vector.load %arg11[%c0_133, %c0_134, %c0_135] : memref<1x3x384xf32, #tpu.memory_space<vmem>>, vector<1x3x384xf32>
    %111 = vector.shape_cast %110 : vector<1x3x384xf32> to vector<3x384xf32>
    %112 = vector.shape_cast %109 : vector<3x384xf32> to vector<1x3x384xf32>
    tpu.vector_store %arg11[%c0_133, %c0_134, %c0_135], %112 {strides = array<i32>} : memref<1x3x384xf32, #tpu.memory_space<vmem>>, vector<1x3x384xf32>,
    return
  }
  func.func @transform_0(%arg0: i32) -> i32 {
    %c0_i32 = arith.constant 0 : i32
    %c0_i32_0 = arith.constant 0 : i32
    return %c0_i32 : i32
  }
  func.func @transform_1(%arg0: i32) -> (i32, i32, i32) {
    %c0_i32 = arith.constant 0 : i32
    %c0_i32_0 = arith.constant 0 : i32
    %c0_i32_1 = arith.constant 0 : i32
    return %arg0, %c0_i32, %c0_i32_0 : i32, i32, i32
  }
  func.func @transform_2(%arg0: i32) -> (i32, i32, i32) {
    %c0_i32 = arith.constant 0 : i32
    %c0_i32_0 = arith.constant 0 : i32
    %c0_i32_1 = arith.constant 0 : i32
    return %arg0, %c0_i32, %c0_i32_0 : i32, i32, i32
  }
  func.func @transform_3(%arg0: i32) -> (i32, i32) {
    %c0_i32 = arith.constant 0 : i32
    %c0_i32_0 = arith.constant 0 : i32
    %c0_i32_1 = arith.constant 0 : i32
    return %c0_i32, %c0_i32_0 : i32, i32
  }
  func.func @transform_4(%arg0: i32) -> (i32, i32) {
    %c0_i32 = arith.constant 0 : i32
    %c0_i32_0 = arith.constant 0 : i32
    %c0_i32_1 = arith.constant 0 : i32
    return %c0_i32, %c0_i32_0 : i32, i32
  }
  func.func @transform_5(%arg0: i32) -> (i32, i32) {
    %c0_i32 = arith.constant 0 : i32
    %c0_i32_0 = arith.constant 0 : i32
    %c0_i32_1 = arith.constant 0 : i32
    return %c0_i32, %c0_i32_0 : i32, i32
  }
  func.func @transform_6(%arg0: i32) -> (i32, i32) {
    %c0_i32 = arith.constant 0 : i32
    %c0_i32_0 = arith.constant 0 : i32
    %c0_i32_1 = arith.constant 0 : i32
    return %c0_i32, %c0_i32_0 : i32, i32
  }
  func.func @transform_7(%arg0: i32) -> (i32, i32) {
    %c0_i32 = arith.constant 0 : i32
    %c0_i32_0 = arith.constant 0 : i32
    %c0_i32_1 = arith.constant 0 : i32
    return %c0_i32, %c0_i32_0 : i32, i32
  }
  func.func @transform_8(%arg0: i32) -> (i32, i32) {
    %c0_i32 = arith.constant 0 : i32
    %c0_i32_0 = arith.constant 0 : i32
    %c0_i32_1 = arith.constant 0 : i32
    return %c0_i32, %c0_i32_0 : i32, i32
  }
  func.func @transform_9(%arg0: i32) -> (i32, i32) {
    %c0_i32 = arith.constant 0 : i32
    %c0_i32_0 = arith.constant 0 : i32
    %c0_i32_1 = arith.constant 0 : i32
    return %c0_i32, %c0_i32_0 : i32, i32
  }
  func.func @transform_10(%arg0: i32) -> (i32, i32, i32) {
    %c0_i32 = arith.constant 0 : i32
    %c0_i32_0 = arith.constant 0 : i32
    %c0_i32_1 = arith.constant 0 : i32
    return %arg0, %c0_i32, %c0_i32_0 : i32, i32, i32
  }
}

</mosaic_0001>

<bundles_post_ra>
// kernel: lut_aware_colornet.1
= control target key start
LH: loop header
LB: loop body
LE: loop exit
PB: predicated region body
PF: predicated region fallthrough
CT: control target
= control target key end

     0   :  { %s4636_s0 = inlined_call_operand.<no memory space> [shape: f32[1], index: 0, kind: input, shape index: {}]   ;;  %s4637_s1 = inlined_call_operand.hbm [shape: bf16[2,8,384], index: 1, kind: input, shape index: {}]   ;;  %s4638_s2 = inlined_call_operand.hbm [shape: f32[2,3,384], index: 2, kind: input, shape index: {}]   ;;  %s4639_s3 = inlined_call_operand.hbm [shape: f32[1,384], index: 3, kind: input, shape index: {}]   ;;  %s4640_s4 = inlined_call_operand.hbm [shape: bf16[32,72], index: 4, kind: input, shape index: {}]   ;;  %s4641_s5 = inlined_call_operand.hbm [shape: f32[32,1], index: 5, kind: input, shape index: {}]   ;;  %s4642_s6 = inlined_call_operand.hbm [shape: bf16[32,288], index: 6, kind: input, shape index: {}]   ;;  %s4643_s7 = inlined_call_operand.hbm [shape: f32[32,1], index: 7, kind: input, shape index: {}]   ;;  %s4644_s8 = inlined_call_operand.hbm [shape: bf16[3,288], index: 8, kind: input, shape index: {}]   ;;  %s4645_s9 = inlined_call_operand.hbm [shape: f32[3,1], index: 9, kind: input, shape index: {}]   ;;  %s4646_s10 = inlined_call_operand.hbm [shape: f32[2,3,384], index: 10, kind: output, shape index: {}]  }
   0x1   :  { %4653 = sst [smem:[#allocation28_spill]] %s4637_s1 }
   0x2   :  { %4654 = sst [smem:[#allocation29_spill]] %s4639_s3 }
   0x3   :  { %4655 = sst [smem:[#allocation30_spill]] %s4640_s4 }
   0x4   :  { %4656 = sst [smem:[#allocation31_spill]] %s4646_s10 }
   0x5   :  { %15 = sst [smem:[#allocation4]] %s4636_s0 }
   0x6   :  { %16 = vsyncpa [#allocation6], 0 }
   0x7   :  { %18 = vsyncpa [#allocation6 + $0x1], 0 }
   0x8   :  { %19 = vsyncpa [#allocation9], 0 }
   0x9   :  { %21 = vsyncpa [#allocation9 + $0x1], 0 }
   0xa   :  { %22 = vsyncpa [#allocation12], 0 }
   0xb   :  { %23 = vsyncpa [#allocation15], 0 }
   0xc   :  { %24 = vsyncpa [#allocation18], 0 }
   0xd   :  { %25 = vsyncpa [#allocation7], 0 }
   0xe   :  { %27 = vsyncpa [#allocation7 + $0x1], 0  ;;  %s3418_s15 = smov 0   ;;  %s3420_s16 = smov 0  }
   0xf   :  { %s3422_s17 = smov 0   ;;  %s3424_s18 = smov 0  }
  0x10 LB: > { %s3330_s0 = smov [#allocation10]   ;;  %s3439_s20 = sadd.s32 4294967295, %s3328_s18   ;;  %s3328_s18 = sphi %s3424_s18, %s4693_s18   ;;  %s3324_s17 = sphi %s3422_s17, %s4692_s17   ;;  %s3320_s16 = sphi %s3420_s16, %s4691_s16   ;;  %s3316_s15 = sphi %s3418_s15, %s4690_s15  }
  0x11   : > { %s300_s19 = sshll.u32 %s3330_s0, 4  ;;  %p2618_p0 = scmp.ge.s32.totalorder %s3328_s18, 1  ;;  %s3444_s19 = int_to_ptr.vmem [resolvable:$true] %s300_s19 }
  0x12   : > { %p4648_p1 = scmp.eq.s32.totalorder %s3439_s20, 0  ;;  %p284_p2 = scmp.lt.s32.totalorder %s3328_s18, 3 }
  0x13   : > { %s3331_s22 = smov [#allocation11]   ;;  %s3332_s25 = smov [#allocation14]  }
  0x14   : > { %p3446_p3 = pnand %p2618_p0, %p284_p2  ;;  %s310_s23 = sshll.u32 %s3331_s22, 4  ;;  %s3453_s23 = int_to_ptr.vmem [resolvable:$true] %s310_s23 }
  0x15   : > { %s336_s26 = sshll.u32 %s3332_s25, 4  ;;  %s4659_s3 = sld [smem:[#allocation29_spill]]  ;;  %s3461_s26 = int_to_ptr.vmem [resolvable:$true] %s336_s26 }
  0x16   : > { %s4657_s21 = scalar_select %p3446_p3, 1, 0 }
  0x17   : > { %p2819_p5 = pneg %p3446_p3 }
  0x19   : > { %p3457_p6 = pnand %p2819_p5, %p4648_p1 }
  0x1b   : > { %s2986_s29 = scalar_lea.hbm %s4659_s3, 48  ;;  %p3471_p8 = pneg %p3457_p6 }
  0x1c   : > { %p2987_p7 = scmp.ne.s32.totalorder %s4659_s3, %s2986_s29  ;;  %p2993_p11 = scmp.lt.u32.totalorder %s2986_s29, %s4659_s3 }
  0x1e   : > { %p2989_p9 = pnand %p3471_p8, %p2987_p7 }
  0x20   : > { %p2990_p10 = pneg %p2989_p9 }
  0x22   : > { %p2995_p12 = pnand %p2993_p11, %p2990_p10 }
  0x24   : > { %2998 = shalt.err (!%p2995_p12)
}
  0x25   : > { %s2999_s0 = scalar_lea.vmem %s3444_s19, 48  ;;  %s3006_s22 = scalar_lea.vmem %s3444_s19, 64 }
  0x26   : > { %p3000_p13 = scmp.ne.s32.totalorder %s3444_s19, %s2999_s0  ;;  %p3007_p5 = scmp.lt.s32.totalorder %s3444_s19, %s3444_s19 }
  0x27   : > { %p3008_p7 = scmp.lt.s32.totalorder %s3006_s22, %s2999_s0 }
  0x28   : > { %p3002_p0 = pnand %p3000_p13, %p3471_p8 }
  0x29   : > { %p3009_p9 = por %p3008_p7, %p3007_p5 }
  0x2a   : > { %p3003_p2 = pneg %p3002_p0 }
  0x2c   : > { %p3010_p4 = pnand %p3009_p9, %p3003_p2 }
  0x2e   : > { %3013 = shalt.err (!%p3010_p4)
}
  0x2f   : > { %2822 = dma.hbm_to_vmem [thread:$0]  (!%p3457_p6), %s4659_s3, 48, %s3444_s19, [#allocation9]  }
  0x30   : > { %s4661_s4 = sld [smem:[#allocation30_spill]] }
  0x36   : > { %s3014_s30 = scalar_lea.hbm %s4661_s4, 256 }
  0x37   : > { %p3015_p10 = scmp.ne.s32.totalorder %s4661_s4, %s3014_s30  ;;  %p3021_p4 = scmp.lt.u32.totalorder %s3014_s30, %s4661_s4 }
  0x39   : > { %p3017_p11 = pnand %p3015_p10, %p3471_p8 }
  0x3b   : > { %p3018_p12 = pneg %p3017_p11 }
  0x3d   : > { %p3023_p13 = pnand %p3021_p4, %p3018_p12 }
  0x3f   : > { %3026 = shalt.err (!%p3023_p13)
}
  0x40   : > { %s3027_s19 = scalar_lea.vmem %s3453_s23, 256  ;;  %p3035_p7 = scmp.lt.s32.totalorder %s3453_s23, %s3453_s23 }
  0x41   : > { %p3028_p0 = scmp.ne.s32.totalorder %s3453_s23, %s3027_s19  ;;  %p3036_p9 = scmp.lt.s32.totalorder %s3027_s19, %s3027_s19 }
  0x43   : > { %p3030_p2 = pnand %p3028_p0, %p3471_p8  ;;  %p3037_p10 = por %p3036_p9, %p3035_p7 }
  0x45   : > { %p3031_p5 = pneg %p3030_p2 }
  0x47   : > { %p3038_p11 = pnand %p3037_p10, %p3031_p5 }
  0x49   : > { %3041 = shalt.err (!%p3038_p11)
}
  0x4a   : > { %s3333_s22 = smov 64   ;;  %s3334_s25 = smov 4  }
  0x4b   : > { %2825 = dma.hbm_to_vmem [thread:$0]  (!%p3457_p6), %s4661_s4, 256, %s3453_s23, [#allocation12], %s3333_s22, %s3333_s22, %s3334_s25  }
  0x4c   : > { %s3042_s11 = scalar_lea.hbm %s4642_s6, 768 }
  0x4d   : > { %p3043_p12 = scmp.ne.s32.totalorder %s4642_s6, %s3042_s11  ;;  %p3049_p0 = scmp.lt.u32.totalorder %s3042_s11, %s4642_s6 }
  0x4f   : > { %p3045_p4 = pnand %p3043_p12, %p3471_p8 }
  0x51   : > { %p3046_p13 = pneg %p3045_p4 }
  0x53   : > { %p3051_p2 = pnand %p3049_p0, %p3046_p13 }
  0x55   : > { %3054 = shalt.err (!%p3051_p2)
}
  0x56   : > { %s3055_s23 = scalar_lea.vmem %s3461_s26, 768  ;;  %p3063_p10 = scmp.lt.s32.totalorder %s3461_s26, %s3461_s26 }
  0x57   : > { %p3056_p5 = scmp.ne.s32.totalorder %s3461_s26, %s3055_s23  ;;  %p3064_p11 = scmp.lt.s32.totalorder %s3055_s23, %s3055_s23 }
  0x59   : > { %p3058_p7 = pnand %p3056_p5, %p3471_p8  ;;  %p3065_p12 = por %p3064_p11, %p3063_p10 }
  0x5b   : > { %p3059_p9 = pneg %p3058_p7 }
  0x5d   : > { %p3066_p4 = pnand %p3065_p12, %p3059_p9 }
  0x5f   : > { %3069 = shalt.err (!%p3066_p4)
}
  0x60   : > { %s3335_s22 = smov 192   ;;  %s3336_s25 = smov 12  }
  0x61   : > { %2831 = dma.hbm_to_vmem [thread:$0]  (!%p3457_p6), %s4642_s6, 768, %s3461_s26, [#allocation15], %s3335_s22, %s3335_s22, %s3336_s25  }
  0x62   : > { %s3337_s29 = smov [#allocation17]   ;;  %s3338_s11 = smov [#allocation13]  }
  0x63   : > { %s363_s30 = sshll.u32 %s3337_s29, 4  ;;  %s323_s13 = sshll.u32 %s3338_s11, 4  ;;  %s364_s30 = int_to_ptr.vmem [resolvable:$true] %s363_s30  ;;  %s324_s13 = int_to_ptr.vmem [resolvable:$true] %s323_s13 }
  0x64   : > { %s3070_s19 = scalar_lea.hbm %s4644_s8, 96 }
  0x65   : > { %p3071_p13 = scmp.ne.s32.totalorder %s4644_s8, %s3070_s19  ;;  %p3077_p5 = scmp.lt.u32.totalorder %s3070_s19, %s4644_s8 }
  0x67   : > { %p3073_p0 = pnand %p3071_p13, %p3471_p8 }
  0x69   : > { %p3074_p2 = pneg %p3073_p0 }
  0x6b   : > { %p3079_p7 = pnand %p3077_p5, %p3074_p2 }
  0x6d   : > { %3082 = shalt.err (!%p3079_p7)
}
  0x6e   : > { %s3083_s26 = scalar_lea.vmem %s364_s30, 96  ;;  %p3091_p12 = scmp.lt.s32.totalorder %s364_s30, %s364_s30 }
  0x6f   : > { %p3084_p9 = scmp.ne.s32.totalorder %s364_s30, %s3083_s26  ;;  %p3092_p4 = scmp.lt.s32.totalorder %s3083_s26, %s3083_s26 }
  0x71   : > { %p3086_p10 = pnand %p3084_p9, %p3471_p8  ;;  %p3093_p1 = por %p3092_p4, %p3091_p12 }
  0x73   : > { %p3087_p11 = pneg %p3086_p10 }
  0x75   : > { %p3094_p3 = pnand %p3093_p1, %p3087_p11 }
  0x77   : > { %3097 = shalt.err (!%p3094_p3)
}
  0x78   : > { %2837 = dma.hbm_to_vmem [thread:$0]  (!%p3457_p6), %s4644_s8, 96, %s364_s30, [#allocation18]  }
  0x79   : > { %s3098_s25 = scalar_lea.hbm %s4641_s5, 512 }
  0x7a   : > { %p3099_p13 = scmp.ne.s32.totalorder %s4641_s5, %s3098_s25  ;;  %p3105_p3 = scmp.lt.u32.totalorder %s3098_s25, %s4641_s5 }
  0x7c   : > { %p3101_p0 = pnand %p3099_p13, %p3471_p8 }
  0x7e   : > { %p3102_p1 = pneg %p3101_p0 }
  0x80   : > { %p3107_p2 = pnand %p3105_p3, %p3102_p1 }
  0x82   : > { %3110 = shalt.err (!%p3107_p2)
}
  0x83   : > { %s3111_s14 = scalar_lea.vmem %s324_s13, 512  ;;  %p3119_p10 = scmp.lt.s32.totalorder %s324_s13, %s324_s13 }
  0x84   : > { %p3112_p5 = scmp.ne.s32.totalorder %s324_s13, %s3111_s14  ;;  %p3120_p11 = scmp.lt.s32.totalorder %s3111_s14, %s3111_s14 }
  0x86   : > { %p3114_p7 = pnand %p3112_p5, %p3471_p8  ;;  %p3121_p12 = por %p3120_p11, %p3119_p10 }
  0x88   : > { %p3115_p9 = pneg %p3114_p7 }
  0x8a   : > { %p3122_p4 = pnand %p3121_p12, %p3115_p9 }
  0x8c   : > { %3125 = shalt.err (!%p3122_p4)
}
  0x8d   : > { %s3339_s30 = smov 128   ;;  %s3340_s0 = smov 8  }
  0x8e   : > { %2828 = dma.hbm_to_vmem [thread:$0]  (!%p3457_p6), %s4641_s5, 512, %s324_s13, [#allocation12], %s3339_s30, %s3339_s30, %s3340_s0  }
  0x8f   : > { %s3341_s26 = smov [#allocation16]   ;;  %s3342_s22 = smov [#allocation19]  }
  0x90   : > { %s349_s3 = sshll.u32 %s3341_s26, 4  ;;  %s374_s4 = sshll.u32 %s3342_s22, 4  ;;  %s350_s3 = int_to_ptr.vmem [resolvable:$true] %s349_s3  ;;  %s375_s4 = int_to_ptr.vmem [resolvable:$true] %s374_s4 }
  0x91   : > { %s3126_s27 = scalar_lea.hbm %s4643_s7, 512 }
  0x92   : > { %p3127_p13 = scmp.ne.s32.totalorder %s4643_s7, %s3126_s27  ;;  %p3133_p3 = scmp.lt.u32.totalorder %s3126_s27, %s4643_s7 }
  0x94   : > { %p3129_p0 = pnand %p3127_p13, %p3471_p8 }
  0x96   : > { %p3130_p1 = pneg %p3129_p0 }
  0x98   : > { %p3135_p2 = pnand %p3133_p3, %p3130_p1 }
  0x9a   : > { %3138 = shalt.err (!%p3135_p2)
}
  0x9b   : > { %s3139_s13 = scalar_lea.vmem %s350_s3, 512  ;;  %p3147_p10 = scmp.lt.s32.totalorder %s350_s3, %s350_s3 }
  0x9c   : > { %p3140_p5 = scmp.ne.s32.totalorder %s350_s3, %s3139_s13  ;;  %p3148_p11 = scmp.lt.s32.totalorder %s3139_s13, %s3139_s13 }
  0x9e   : > { %p3142_p7 = pnand %p3140_p5, %p3471_p8  ;;  %p3149_p12 = por %p3148_p11, %p3147_p10 }
  0xa0   : > { %p3143_p9 = pneg %p3142_p7 }
  0xa2   : > { %p3150_p4 = pnand %p3149_p12, %p3143_p9 }
  0xa4   : > { %3153 = shalt.err (!%p3150_p4)
}
  0xa5   : > { %2834 = dma.hbm_to_vmem [thread:$0]  (!%p3457_p6), %s4643_s7, 512, %s350_s3, [#allocation15], %s3339_s30, %s3339_s30, %s3340_s0  }
  0xa6   : > { %s3154_s10 = scalar_lea.hbm %s4645_s9, 64 }
  0xa7   : > { %p3155_p13 = scmp.ne.s32.totalorder %s4645_s9, %s3154_s10  ;;  %p3161_p3 = scmp.lt.u32.totalorder %s3154_s10, %s4645_s9 }
  0xa9   : > { %p3157_p0 = pnand %p3155_p13, %p3471_p8 }
  0xab   : > { %p3158_p1 = pneg %p3157_p0 }
  0xad   : > { %p3163_p2 = pnand %p3161_p3, %p3158_p1 }
  0xaf   : > { %3166 = shalt.err (!%p3163_p2)
}
  0xb0   : > { %s3167_s11 = scalar_lea.vmem %s375_s4, 64  ;;  %p3175_p10 = scmp.lt.s32.totalorder %s375_s4, %s375_s4 }
  0xb1   : > { %p3168_p5 = scmp.ne.s32.totalorder %s375_s4, %s3167_s11  ;;  %p3176_p11 = scmp.lt.s32.totalorder %s3167_s11, %s3167_s11 }
  0xb3   : > { %p3170_p7 = pnand %p3168_p5, %p3471_p8  ;;  %p3177_p12 = por %p3176_p11, %p3175_p10 }
  0xb5   : > { %p3171_p9 = pneg %p3170_p7 }
  0xb7   : > { %p3178_p4 = pnand %p3177_p12, %p3171_p9 }
  0xb9   : > { %3181 = shalt.err (!%p3178_p4)
}
  0xba   : > { %2840 = dma.hbm_to_vmem [thread:$0]  (!%p3457_p6), %s4645_s9, 64, %s375_s4, [#allocation18]  }
  0xbb   : > { %s2617_s12 = sadd.s32 4294967294, %s3328_s18   ;;  %s3613_s24 = sadd.s32 1, %s3328_s18  }
  0xbc   : > { %s61_s3 = sadd.s32 1, %s3324_s17  ;;  %s58_s14 = ssub.s32 %s3328_s18, %s3613_s24 }
  0xbd   : > { %p68_p8 = scmp.ne.s32.totalorder %s3324_s17, %s3320_s16  ;;  %p59_p13 = scmp.eq.s32.totalorder %s58_s14, 0 }
  0xbe   : > { %p69_p0 = scmp.eq.s32.totalorder %s3328_s18, 0  ;;  %p74_p1 = scmp.ne.s32.totalorder %s3320_s16, %s3316_s15 }
  0xbf   : > { %p271_p3 = scmp.eq.s32.totalorder %s3439_s20, 1  ;;  %p4662_p5 = scmp.eq.s32.totalorder %s3439_s20, 0 }
  0xc0   : > { %s3625_s13 = scalar_select %p59_p13, %s3324_s17, %s61_s3  }
  0xc1   : > { %p70_p2 = por %p69_p0, %p68_p8  ;;  %p3629_p6 = por %p4662_p5, %p74_p1 }
  0xc2   : > { %p3633_p7 = por %p271_p3, %p68_p8  ;;  %p277_p9 = scmp.eq.s32.totalorder %s2617_s12, 1 }
  0xc3   : > { %s4663_s4 = scalar_select %p3629_p6, 1, 0 }
  0xc4   : > { %s4664_s19 = scalar_select %p3633_p7, 1, 0 }
  0xc5   : > { %p2859_p10 = scmp.lt.s32.totalorder %s3328_s18, 2  ;;  %s385_s23 = sand.u32 1, %s3324_s17  }
  0xc6   : > { %p3639_p11 = por %p277_p9, %p74_p1  ;;  %s3643_s22 = smul.u32 12, %s385_s23 }
  0xc7   : > { %p3645_p12 = pnand %p2859_p10, %p70_p2  ;;  %s4650_s25 = smul.u32 192, %s3328_s18 }
  0xc8   : > { %s4665_s26 = scalar_select %p3639_p11, 1, 0 }
  0xc9   : > { %s4667_s1 = sld [smem:[#allocation28_spill]]  ;;  %s389_s30 = scalar_lea.vmem [#allocation5], %s3643_s22 }
  0xca   : > { %s397_s0 = sshll.u32 %s389_s30, 4  ;;  %s386_s12 = scalar_lea.sflag [#allocation6], %s385_s23  ;;  %s3659_s0 = int_to_ptr.vmem [resolvable:$true] %s397_s0 }
  0xcb   : > { %p3184_p8 = pneg %p3645_p12 }
  0xcf   : > { %s3656_s11 = scalar_lea.hbm %s4667_s1, %s4650_s25  ;;  %s3187_s29 = scalar_lea.hbm %s4667_s1, 384 }
  0xd0   : > { %s3182_s3 = scalar_lea.hbm %s3656_s11, 192  ;;  %p3188_p1 = scmp.lt.u32.totalorder %s3656_s11, %s4667_s1 }
  0xd1   : > { %p3183_p4 = scmp.ne.s32.totalorder %s3656_s11, %s3182_s3  ;;  %p3189_p3 = scmp.lt.u32.totalorder %s3187_s29, %s3182_s3 }
  0xd2   : > { %p3191_p5 = scmp.lt.u32.totalorder %s3182_s3, %s3656_s11 }
  0xd3   : > { %p3185_p13 = pnand %p3184_p8, %p3183_p4  ;;  %p3190_p2 = por %p3189_p3, %p3188_p1 }
  0xd5   : > { %p3186_p0 = pneg %p3185_p13  ;;  %p3192_p9 = por %p3191_p5, %p3190_p2 }
  0xd7   : > { %p3193_p10 = pnand %p3192_p9, %p3186_p0 }
  0xd9   : > { %3196 = shalt.err (!%p3193_p10)
}
  0xda   : > { %s3197_s23 = scalar_lea.vmem %s3659_s0, 192  ;;  %s3343_s30 = smov [#allocation5]  }
  0xdb   : > { %p3198_p4 = scmp.ne.s32.totalorder %s3659_s0, %s3197_s23  ;;  %s3202_s14 = sshll.u32 %s3343_s30, 4  ;;  %s3203_s14 = int_to_ptr.vmem [resolvable:$false] %s3202_s14 }
  0xdc   : > { %s3204_s25 = scalar_lea.vmem %s3203_s14, 384  ;;  %p3205_p7 = scmp.lt.s32.totalorder %s3659_s0, %s3203_s14 }
  0xdd   : > { %p3200_p13 = pnand %p3198_p4, %p3184_p8  ;;  %p3206_p1 = scmp.lt.s32.totalorder %s3204_s25, %s3197_s23 }
  0xdf   : > { %p3201_p11 = pneg %p3200_p13  ;;  %p3207_p3 = por %p3206_p1, %p3205_p7 }
  0xe1   : > { %p3208_p2 = pnand %p3207_p3, %p3201_p11 }
  0xe3   : > { %3211 = shalt.err (!%p3208_p2)
}
  0xe4   : > { %2844 = dma.hbm_to_vmem [thread:$0]  (!%p3645_p12), %s3656_s11, 192, %s3659_s0, %s386_s12  }
  0xe5   : > { %s4668_s27 = smul.u32 192, %s3328_s18  ;;  %s408_s23 = scalar_lea.vmem [#allocation8], %s3643_s22 }
  0xe6   : > { %s416_s30 = sshll.u32 %s408_s23, 4  ;;  %s4669_s14 = sand.u32 1, %s3328_s18   ;;  %s417_s30 = int_to_ptr.vmem [resolvable:$true] %s416_s30 }
  0xe7   : > { %s3691_s29 = scalar_lea.hbm %s4638_s2, %s4668_s27  ;;  %s405_s25 = scalar_lea.sflag [#allocation9], %s4669_s14 }
  0xe8   : > { %s3212_s1 = scalar_lea.hbm %s3691_s29, 192  ;;  %s3217_s12 = scalar_lea.hbm %s4638_s2, 384 }
  0xe9   : > { %p3213_p7 = scmp.ne.s32.totalorder %s3691_s29, %s3212_s1  ;;  %p3218_p5 = scmp.lt.u32.totalorder %s3691_s29, %s4638_s2 }
  0xea   : > { %p3219_p9 = scmp.lt.u32.totalorder %s3217_s12, %s3212_s1  ;;  %p3221_p4 = scmp.lt.u32.totalorder %s3212_s1, %s3691_s29 }
  0xeb   : > { %p3215_p11 = pnand %p3213_p7, %p3184_p8 }
  0xec   : > { %p3220_p10 = por %p3219_p9, %p3218_p5 }
  0xed   : > { %p3216_p0 = pneg %p3215_p11 }
  0xee   : > { %p3222_p13 = por %p3221_p4, %p3220_p10 }
  0xf0   : > { %p3223_p1 = pnand %p3222_p13, %p3216_p0 }
  0xf2   : > { %3226 = shalt.err (!%p3223_p1)
}
  0xf3   : > { %s3227_s22 = scalar_lea.vmem %s417_s30, 192  ;;  %s3344_s28 = smov [#allocation8]  }
  0xf4   : > { %p3228_p3 = scmp.ne.s32.totalorder %s417_s30, %s3227_s22  ;;  %s3232_s23 = sshll.u32 %s3344_s28, 4  ;;  %s3233_s23 = int_to_ptr.vmem [resolvable:$false] %s3232_s23 }
  0xf5   : > { %s3234_s14 = scalar_lea.vmem %s3233_s23, 384  ;;  %p3235_p11 = scmp.lt.s32.totalorder %s417_s30, %s3233_s23 }
  0xf6   : > { %p3230_p2 = pnand %p3228_p3, %p3184_p8  ;;  %p3236_p6 = scmp.lt.s32.totalorder %s3234_s14, %s3227_s22 }
  0xf8   : > { %p3231_p7 = pneg %p3230_p2  ;;  %p3237_p5 = por %p3236_p6, %p3235_p11 }
  0xfa   : > { %p3238_p9 = pnand %p3237_p5, %p3231_p7 }
  0xfc   : > { %3241 = shalt.err (!%p3238_p9)
}
  0xfd   : > { %2847 = dma.hbm_to_vmem [thread:$0]  (!%p3645_p12), %s3691_s29, 192, %s417_s30, %s405_s25  }
  0xfe   : > { %p4670_p0 = scmp.ne.s32.totalorder %s4657_s21, 0 }
  0xff   : > { %s3718_s1 = sand.u32 (!%p4670_p0), 1, %s3320_s16   ;;  %p4671_p6 = scmp.ne.s32.totalorder (!%p4670_p0), %s4663_s4, 0 }
 0x100   : > { %425 = sbr.rel (%p4670_p0) target bundleno = 1629 (0x65d), region = 60  ;;  %s428_s0 = scalar_lea.sflag (!%p4670_p0), [#allocation6], %s3718_s1 }
 0x101   : > { %s3721_s11 = smul.u32 (!%p4670_p0), 12, %s3718_s1 }
 0x103   : > { %s431_s12 = scalar_lea.vmem (!%p4670_p0), [#allocation5], %s3721_s11 }
 0x107   : > { %3287 = dma.done.wait (%p4671_p6), %s428_s0, 192  }
 0x108   : > { %3289 = vsyncadd (%p4671_p6), %s428_s0, 4294967104  ;;  %s436_s21 = sand.u32 1, %s3439_s20   ;;  %s440_s29 = scalar_lea.vmem [#allocation8], %s3721_s11 }
 0x109   : > { %s437_s10 = scalar_lea.sflag [#allocation9], %s436_s21 }
 0x10a   : > { %3291 = dma.done.wait (%p4671_p6), %s437_s10, 192  }
 0x10b   : > { %3293 = vsyncadd (%p4671_p6), %s437_s10, 4294967104  ;;  %p4672_p12 = scmp.eq.s32.totalorder %s3439_s20, 0 }
 0x10d   : > { %3295 = dma.done.wait (%p4672_p12), [#allocation9], 48   ;;  %p4673_p8 = pmov %p4672_p12 }
 0x10f   : > { %3297 = vsyncadd (%p4673_p8), [#allocation9], 4294967248  ;;  %p4674_p10 = pmov %p4673_p8 }
 0x110   : > { %p4675_p4 = pmov %p4673_p8 }
 0x111   : > { %3299 = dma.done.wait (%p4674_p10), [#allocation12], 768  }
 0x112   : > { %3301 = vsyncadd (%p4675_p4), [#allocation12], 4294966528  ;;  %p4676_p13 = pmov %p4675_p4 }
 0x113   : > { %p4677_p1 = pmov %p4675_p4 }
 0x114   : > { %3303 = dma.done.wait (%p4676_p13), [#allocation15], 1280  }
 0x115   : > { %3305 = vsyncadd (%p4677_p1), [#allocation15], 4294966016  ;;  %p4678_p3 = pmov %p4677_p1 }
 0x116   : > { %p4679_p2 = pmov %p4677_p1 }
 0x117   : > { %3307 = dma.done.wait (%p4678_p3), [#allocation18], 160  }
 0x118   : > { %3309 = vsyncadd (%p4679_p2), [#allocation18], 4294967136  ;;  %v3345_v0 = vmov 0   ;;  %v517_v1 = vld [vmem:[%s431_s12] sm:$0xff]  ;;  %v2931_v2 = vld [vmem:[%s431_s12 + $0x8] ss:$0 sps:$4 sm:$0xff]  }
 0x119   : > { %511 = vst [vmem:[#allocation2] sm:$0xff] %v3345_v0  ;;  %513 = vst [vmem:[#allocation2 + $0x20] sm:$0xff] %v3345_v0  ;;  %865 = vmatprep.mubr.bf16.mxu0 %v3345_v0  ;;  %2928 = vset.pattern.permute.xlu1 %v3345_v0  ;;  %v2637_v5 = vcombine.low %v517_v1, %v517_v1  ;;  %v2638_v6 = vcombine.high %v517_v1, %v517_v1  ;;  %s3346_s4 = smov 19   ;;  %s3347_s30 = smov 18   ;;  %v3778_v44 = vld [vmem:[#allocation11] sm:$0xff]   ;;  %vm816_vm0 = vcmask 588800  }
 0x11a   : > { %2927 = vset.pattern.permute.xlu0 %v3345_v0  ;;  %532 = vst [vmem:[#allocation2 + $0x18] sm:$0xf] %v2931_v2  ;;  %s3348_s25 = smov 17   ;;  %s3349_s27 = smov 1   ;;  %2736 = vmatprep.mubr.msk.bf16.mxu1 %vm816_vm0, %v3778_v44  ;;  %v783_v57 = vld [vmem:[#allocation13 + $0x8] sm:$0xff]  ;;  %v782_v58 = vld [vmem:[#allocation13] sm:$0xff] }
 0x11b   : > { %530 = vst [vmem:[#allocation2 + $0x8] sm:$0xf] %v2637_v5  ;;  %531 = vst [vmem:[#allocation2 + $0x10] sm:$0xf] %v2638_v6  ;;  %s3350_s3 = smov 127   ;;  %s3351_s22 = smov 111  }
 0x11c   : > { %s3352_s28 = smov 110   ;;  %s3353_s23 = smov 109   ;;  %v784_v59 = vld [vmem:[#allocation13 + $0x10] sm:$0xff]  ;;  %v785_v60 = vld [vmem:[#allocation13 + $0x18] sm:$0xff]  ;;  %vm549_vm1 = vcmask 154624   ;;  %vm579_vm2 = vcmask 146432  }
 0x11d   : > { %vm605_vm3 = vcmask 138240   ;;  %vm635_vm4 = vcmask 7168   ;;  %vm671_vm5 = vcmask 1039360   ;;  %vm697_vm6 = vcmask 908288   ;;  %s2422_s14 = sld [smem:[#allocation4]]  ;;  %p4687_p11 = scmp.ne.s32.totalorder %s4664_s19, 0 }
 0x11e   : > { %vm727_vm7 = vcmask 900096   ;;  %vm753_vm8 = vcmask 891904   ;;  %vm823_vm9 = vcmask 1043456   ;;  %s3357_s0 = smov 0.05  }
 0x11f   : > { %s3358_s21 = smov 0.4  }
 0x120   : > { %v533_v3 = vld [vmem:[#allocation2] sm:$0xf] }
 0x121   : > { %v559_v4 = vld [vmem:[#allocation2] sm:$0xf]  ;;  %541 = vrot.lane.b32.xlu0 %v533_v3, %s3346_s4  ;;  %v653_v26 = vld [vmem:[#allocation2 + $0x18] sm:$0xf] }
 0x122   : > { %v567_v7 = vrot.slane %v559_v4, 4  ;;  %v615_v8 = vld [vmem:[#allocation2] sm:$0xf]  ;;  %v534_v11 = vld [vmem:[#allocation2 + $0x8] sm:$0xf]  ;;  %v661_v28 = vrot.slane %v653_v26, 4 }
 0x123   : > { %v589_v9 = vld [vmem:[#allocation2] sm:$0xf]  ;;  %v623_v10 = vrot.slane %v615_v8, 4  ;;  %v591_v12 = vld [vmem:[#allocation2 + $0x10] sm:$0xf]  ;;  %s2423_s12 = smax.f32 %s3357_s0, %s2422_s14 }
 0x124   : > { %571 = vrot.lane.b32.xlu1 %v567_v7, %s3347_s30  ;;  %v560_v13 = vld [vmem:[#allocation2 + $0x8] sm:$0xf]  ;;  %v535_v14 = vld [vmem:[#allocation2 + $0x10] sm:$0xf]  ;;  %v683_v33 = vld [vmem:[#allocation2 + $0x18] sm:$0xf]  ;;  %s2424_s10 = smin.f32 %s3358_s21, %s2423_s12 }
 0x125   : > { %597 = vrot.lane.b32.xlu0 %v589_v9, %s3348_s25  ;;  %v568_v15 = vrot.slane %v560_v13, 4  ;;  %v561_v16 = vld [vmem:[#allocation2 + $0x10] sm:$0xf]  ;;  %v590_v17 = vld [vmem:[#allocation2 + $0x8] sm:$0xf] }
 0x126   : > { %v569_v18 = vrot.slane %v561_v16, 4  ;;  %v616_v19 = vld [vmem:[#allocation2 + $0x8] sm:$0xf]  ;;  %v617_v20 = vld [vmem:[#allocation2 + $0x10] sm:$0xf] }
 0x127   : > { %v624_v21 = vrot.slane %v616_v19, 4  ;;  %v646_v22 = vld [vmem:[#allocation2 + $0x10] sm:$0xf]  ;;  %v625_v23 = vrot.slane %v617_v20, 4  ;;  %v645_v25 = vld [vmem:[#allocation2 + $0x8] sm:$0xf] }
 0x128   : > { %627 = vrot.lane.b32.xlu1 %v623_v10, %s3349_s27  ;;  %v652_v24 = vld [vmem:[#allocation2 + $0x10] sm:$0xf]  ;;  %649 = vst [vmem:[#allocation3 + $0x38] sm:$0xf] %v646_v22  ;;  %648 = vst [vmem:[#allocation3 + $0x30] sm:$0xf] %v645_v25 }
 0x129   : > { %543 = vrot.lane.b32.xlu0 %v534_v11, %s3346_s4  ;;  %v660_v27 = vrot.slane %v652_v24, 4  ;;  %v651_v29 = vld [vmem:[#allocation2 + $0x8] sm:$0xf]  ;;  %v682_v31 = vld [vmem:[#allocation2 + $0x10] sm:$0xf] }
 0x12a   : > { %v659_v30 = vrot.slane %v651_v29, 4  ;;  %v708_v32 = vld [vmem:[#allocation2 + $0x10] sm:$0xf]  ;;  %v709_v35 = vld [vmem:[#allocation2 + $0x18] sm:$0xf] }
 0x12b   : > { %v716_v34 = vrot.slane %v708_v32, 4  ;;  %v717_v36 = vrot.slane %v709_v35, 4  ;;  %v707_v37 = vld [vmem:[#allocation2 + $0x8] sm:$0xf]  ;;  %v738_v41 = vld [vmem:[#allocation2 + $0x10] sm:$0xf] }
 0x12c   : > { %601 = vrot.lane.b32.xlu1 %v591_v12, %s3348_s25  ;;  %v681_v38 = vld [vmem:[#allocation2 + $0x8] sm:$0xf]  ;;  %v715_v39 = vrot.slane %v707_v37, 4  ;;  %v739_v42 = vld [vmem:[#allocation2 + $0x18] sm:$0xf] }
 0x12d   : > { %545 = vrot.lane.b32.xlu0 %v535_v14, %s3346_s4  ;;  %v737_v40 = vld [vmem:[#allocation2 + $0x8] sm:$0xf]  ;;  %v562_v43 = vld [vmem:[#allocation2 + $0x18] sm:$0xf]  ;;  %v654_v51 = vld [vmem:[#allocation2 + $0x20] sm:$0xf] }
 0x12e   : > { %v647_v45 = vld [vmem:[#allocation2 + $0x18] sm:$0xf]  ;;  %v570_v47 = vrot.slane %v562_v43, 4  ;;  %v662_v52 = vrot.slane %v654_v51, 4  ;;  %v710_v53 = vld [vmem:[#allocation2 + $0x20] sm:$0xf] }
 0x12f   : > { %650 = vst [vmem:[#allocation3 + $0x40] sm:$0xf] %v647_v45  ;;  %v536_v46 = vld [vmem:[#allocation2 + $0x18] sm:$0xf]  ;;  %v684_v54 = vld [vmem:[#allocation2 + $0x20] sm:$0xf] }
 0x130   : > { %573 = vrot.lane.b32.xlu1 %v568_v15, %s3347_s30  ;;  %v618_v48 = vld [vmem:[#allocation2 + $0x18] sm:$0xf]  ;;  %v718_v55 = vrot.slane %v710_v53, 4  ;;  %v740_v56 = vld [vmem:[#allocation2 + $0x20] sm:$0xf] }
 0x131   : > { %599 = vrot.lane.b32.xlu0 %v590_v17, %s3348_s25  ;;  %v592_v49 = vld [vmem:[#allocation2 + $0x18] sm:$0xf]  ;;  %v626_v50 = vrot.slane %v618_v48, 4 }
 0x134   : > { %575 = vrot.lane.b32.xlu1 %v569_v18, %s3347_s30 }
 0x135   : > { %629 = vrot.lane.b32.xlu0 %v624_v21, %s3349_s27 }
 0x138   : > { %631 = vrot.lane.b32.xlu1 %v625_v23, %s3349_s27 }
 0x139   : > { %665 = vrot.lane.b32.xlu0 %v660_v27, %s3350_s3 }
 0x13c   : > { %667 = vrot.lane.b32.xlu1 %v661_v28, %s3350_s3 }
 0x13d   : > { %663 = vrot.lane.b32.xlu0 %v659_v30, %s3350_s3 }
 0x140   : > { %691 = vrot.lane.b32.xlu1 %v682_v31, %s3351_s22 }
 0x141   : > { %693 = vrot.lane.b32.xlu0 %v683_v33, %s3351_s22 }
 0x144   : > { %721 = vrot.lane.b32.xlu1 %v716_v34, %s3352_s28 }
 0x145   : > { %723 = vrot.lane.b32.xlu0 %v717_v36, %s3352_s28 }
 0x148   : > { %689 = vrot.lane.b32.xlu1 %v681_v38, %s3351_s22 }
 0x149   : > { %719 = vrot.lane.b32.xlu0 %v715_v39, %s3352_s28 }
 0x14c   : > { %745 = vrot.lane.b32.xlu1 %v737_v40, %s3353_s23 }
 0x14d   : > { %747 = vrot.lane.b32.xlu0 %v738_v41, %s3353_s23 }
 0x150   : > { %749 = vrot.lane.b32.xlu1 %v739_v42, %s3353_s23 }
 0x151   : > { %547 = vrot.lane.b32.xlu0 %v536_v46, %s3346_s4 }
 0x154   : > { %577 = vrot.lane.b32.xlu1 %v570_v47, %s3347_s30 }
 0x155   : > { %603 = vrot.lane.b32.xlu0 %v592_v49, %s3348_s25 }
 0x158   : > { %633 = vrot.lane.b32.xlu1 %v626_v50, %s3349_s27 }
 0x159   : > { %669 = vrot.lane.b32.xlu0 %v662_v52, %s3350_s3 }
 0x15c   : > { %695 = vrot.lane.b32.xlu1 %v684_v54, %s3351_s22 }
 0x15d   : > { %725 = vrot.lane.b32.xlu0 %v718_v55, %s3352_s28 }
 0x160   : > { %751 = vrot.lane.b32.xlu1 %v740_v56, %s3353_s23 }
 0x161   : > { %788 = vperm.xlu0 %2927, %v782_v58  }
 0x164   : > { %793 = vperm.xlu1 %2928, %v783_v57  }
 0x165   : > { %803 = vperm.xlu0 %2927, %v785_v60  }
 0x168   : > { %798 = vperm.xlu1 %2928, %v784_v59  }
 0x169   : > { %1011 = vrot.lane.b32.xlu0 %v3345_v0, %s3346_s4 }
 0x16c   : > { %1003 = vrot.lane.b32.xlu1 %v3345_v0, %s3346_s4 }
 0x16d   : > { %1061 = vrot.lane.b32.xlu0 %v3345_v0, %s3347_s30 }
 0x170   : > { %1053 = vrot.lane.b32.xlu1 %v3345_v0, %s3347_s30 }
 0x174   : > { %1103 = vrot.lane.b32.xlu1 %v3345_v0, %s3348_s25 }
 0x193   : > { %v542_v61 = vpop.permute.xlu0 %541 }
 0x196   : > { %v572_v62 = vpop.permute.xlu1 %571 }
 0x197   : > { %v598_v63 = vpop.permute.xlu0 %597 }
 0x19a   : > { %v628_v1 = vpop.permute.xlu1 %627 }
 0x19b   : > { %v544_v2 = vpop.permute.xlu0 %543 }
 0x19c   : > { %v550_v3 = vsel %vm549_vm1, %v542_v61, %v544_v2 }
 0x19d   : > { %556 = vst [vmem:[#allocation3] sm:$0xf] %v550_v3 }
 0x19e   : > { %v3803_v4 = vpop.permute.xlu1 %601 }
 0x19f   : > { %v3805_v5 = vpop.permute.xlu0 %545 }
 0x1a0   : > { %v551_v6 = vsel %vm549_vm1, %v544_v2, %v3805_v5 }
 0x1a1   : > { %557 = vst [vmem:[#allocation3 + $0x8] sm:$0xf] %v551_v6 }
 0x1a2   : > { %v574_v7 = vpop.permute.xlu1 %573 }
 0x1a3   : > { %v580_v8 = vsel %vm579_vm2, %v572_v62, %v574_v7  ;;  %v600_v9 = vpop.permute.xlu0 %599 }
 0x1a4   : > { %586 = vst [vmem:[#allocation3] sm:$0xf0] %v580_v8  ;;  %v606_v10 = vsel %vm605_vm3, %v598_v63, %v600_v9  ;;  %v607_v11 = vsel %vm605_vm3, %v600_v9, %v3803_v4  ;;  %v948_v9 = vlaneseq }
 0x1a5   : > { %612 = vst [vmem:[#allocation3 + $0x18] sm:$0xf] %v606_v10  ;;  %613 = vst [vmem:[#allocation3 + $0x20] sm:$0xf] %v607_v11  ;;  %v515_v10 = vld [vmem:[#allocation10] sm:$0x7] }
 0x1a6   : > { %v3813_v12 = vpop.permute.xlu1 %575  ;;  %v3855_v11 = vshrl.u32 %v948_v9, 7  ;;  %vm516_vm10 = vcmp.gt.f32.partialorder %v515_v10, 0.5 }
 0x1a7   : > { %v581_v13 = vsel %vm579_vm2, %v574_v7, %v3813_v12  ;;  %v630_v14 = vpop.permute.xlu0 %629 }
 0x1a8   : > { %587 = vst [vmem:[#allocation3 + $0x8] sm:$0xf0] %v581_v13  ;;  %v636_v15 = vsel %vm635_vm4, %v628_v1, %v630_v14  ;;  %v947_v13 = vsel %vm516_vm10, 1, %v3345_v0 }
 0x1a9   : > { %642 = vst [vmem:[#allocation3 + $0x18] sm:$0xf0] %v636_v15 }
 0x1aa   : > { %v3818_v16 = vpop.permute.xlu1 %631 }
 0x1ab   : > { %v637_v17 = vsel %vm635_vm4, %v630_v14, %v3818_v16  ;;  %v666_v18 = vpop.permute.xlu0 %665  ;;  %v767_v22 = vld [vmem:[#allocation3] sm:$0xff]  ;;  %v954_v14 = vsub.s32 1, %v3855_v11 }
 0x1ac   : > { %643 = vst [vmem:[#allocation3 + $0x20] sm:$0xf0] %v637_v17 }
 0x1ae   : > { %v3822_v19 = vpop.permute.xlu1 %667 }
 0x1af   : > { %v673_v20 = vsel %vm671_vm5, %v666_v18, %v3822_v19  ;;  %v768_v21 = vld [vmem:[#allocation3 + $0x8] sm:$0xff]  ;;  %v664_v23 = vpop.permute.xlu0 %663 }
 0x1b0   : > { %679 = vst [vmem:[#allocation3 + $0x38] sm:$0xf0] %v673_v20  ;;  %833 = vmatprep.subr.bf16.mxu0 %v768_v21  ;;  %v672_v24 = vsel %vm671_vm5, %v664_v23, %v666_v18  ;;  %v770_v27 = vld [vmem:[#allocation3 + $0x18] sm:$0xff]  ;;  %v3864_v20 = vrot.slane %v947_v13, %v954_v14 }
 0x1b1   : > { %834 = vmatpush1.bf16.msra.mxu0 %v767_v22  ;;  %678 = vst [vmem:[#allocation3 + $0x30] sm:$0xf0] %v672_v24 }
 0x1b2   : > { %v692_v25 = vpop.permute.xlu1 %691  ;;  %vm961_vm12 = vcmp.eq.s32.totalorder %v3864_v20, 1 }
 0x1b3   : > { %v771_v26 = vld [vmem:[#allocation3 + $0x20] sm:$0xff]  ;;  %v694_v28 = vpop.permute.xlu0 %693  ;;  %vm4126_vm15 = vmpackc.low %vm961_vm12, %vm961_vm12 }
 0x1b4   : > { %835 = vmatprep.subr.bf16.mxu0 %v771_v26  ;;  %v699_v29 = vsel %vm697_vm6, %v692_v25, %v694_v28 }
 0x1b5   : > { %836 = vmatpush1.bf16.msra.mxu0 %v770_v27  ;;  %705 = vst [vmem:[#allocation3 + $0x50] sm:$0xf] %v699_v29 }
 0x1b6   : > { %v722_v30 = vpop.permute.xlu1 %721 }
 0x1b7   : > { %v774_v31 = vld [vmem:[#allocation3 + $0x38] sm:$0xff]  ;;  %v724_v32 = vpop.permute.xlu0 %723 }
 0x1b8   : > { %837 = vmatprep.subr.bf16.mxu0 %v774_v31  ;;  %v729_v33 = vsel %vm727_vm7, %v722_v30, %v724_v32  ;;  %v773_v35 = vld [vmem:[#allocation3 + $0x30] sm:$0xff] }
 0x1b9   : > { %735 = vst [vmem:[#allocation3 + $0x50] sm:$0xf0] %v729_v33  ;;  %838 = vmatpush1.bf16.msra.mxu0 %v773_v35 }
 0x1ba   : > { %v690_v34 = vpop.permute.xlu1 %689 }
 0x1bb   : > { %v698_v36 = vsel %vm697_vm6, %v690_v34, %v692_v25  ;;  %v720_v37 = vpop.permute.xlu0 %719 }
 0x1bc   : > { %704 = vst [vmem:[#allocation3 + $0x48] sm:$0xf] %v698_v36  ;;  %v728_v38 = vsel %vm727_vm7, %v720_v37, %v722_v30 }
 0x1bd   : > { %734 = vst [vmem:[#allocation3 + $0x48] sm:$0xf0] %v728_v38 }
 0x1be   : > { %v746_v39 = vpop.permute.xlu1 %745 }
 0x1bf   : > { %v748_v40 = vpop.permute.xlu0 %747 }
 0x1c0   : > { %v754_v41 = vsel %vm753_vm8, %v746_v39, %v748_v40  ;;  %v777_v43 = vld [vmem:[#allocation3 + $0x50] sm:$0xff] }
 0x1c1   : > { %760 = vst [vmem:[#allocation3 + $0x60] sm:$0xf] %v754_v41  ;;  %839 = vmatprep.subr.bf16.mxu0 %v777_v43 }
 0x1c2   : > { %v750_v42 = vpop.permute.xlu1 %749 }
 0x1c3   : > { %v755_v45 = vsel %vm753_vm8, %v748_v40, %v750_v42  ;;  %v548_v46 = vpop.permute.xlu0 %547 }
 0x1c4   : > { %761 = vst [vmem:[#allocation3 + $0x68] sm:$0xf] %v755_v45  ;;  %v552_v47 = vsel %vm549_vm1, %v3805_v5, %v548_v46  ;;  %v776_v49 = vld [vmem:[#allocation3 + $0x48] sm:$0xff] }
 0x1c5   : > { %558 = vst [vmem:[#allocation3 + $0x10] sm:$0xf] %v552_v47  ;;  %840 = vmatpush1.bf16.msra.mxu0 %v776_v49  ;;  %v2933_v5 = vld [vmem:[#allocation11 + $0x8] sm:$0xff]  }
 0x1c6   : > { %v578_v48 = vpop.permute.xlu1 %577 }
 0x1c7   : > { %v582_v50 = vsel %vm579_vm2, %v3813_v12, %v578_v48  ;;  %v604_v51 = vpop.permute.xlu0 %603  ;;  %v950_v12 = vsub.s32 0, %v3855_v11 }
 0x1c8   : > { %588 = vst [vmem:[#allocation3 + $0x10] sm:$0xf0] %v582_v50  ;;  %v608_v52 = vsel %vm605_vm3, %v3803_v4, %v604_v51  ;;  %v779_v54 = vld [vmem:[#allocation3 + $0x60] sm:$0xf] }
 0x1c9   : > { %614 = vst [vmem:[#allocation3 + $0x28] sm:$0xf] %v608_v52  ;;  %v825_v57 = vsel %vm823_vm9, %v779_v54, 0  ;;  %v3860_v17 = vrot.slane %v947_v13, %v950_v12 }
 0x1ca   : > { %v634_v53 = vpop.permute.xlu1 %633 }
 0x1cb   : > { %v638_v55 = vsel %vm635_vm4, %v3818_v16, %v634_v53  ;;  %v780_v56 = vld [vmem:[#allocation3 + $0x68] sm:$0xf]  ;;  %v670_v58 = vpop.permute.xlu0 %669  ;;  %vm960_vm11 = vcmp.eq.s32.totalorder %v3860_v17, 1 }
 0x1cc   : > { %644 = vst [vmem:[#allocation3 + $0x28] sm:$0xf0] %v638_v55  ;;  %2642 = vmatprep.subr.msk.bf16.mxu0 %vm823_vm9, %v780_v56  ;;  %v674_v59 = vsel %vm671_vm5, %v3822_v19, %v670_v58 }
 0x1cd   : > { %842 = vmatpush1.bf16.msra.mxu0 %v825_v57  ;;  %680 = vst [vmem:[#allocation3 + $0x40] sm:$0xf0] %v674_v59  ;;  %v958_v57 = vsub.s32 2, %v3855_v11 }
 0x1ce   : > { %v696_v60 = vpop.permute.xlu1 %695 }
 0x1cf   : > { %v700_v61 = vsel %vm697_vm6, %v694_v28, %v696_v60  ;;  %v769_v62 = vld [vmem:[#allocation3 + $0x10] sm:$0xff]  ;;  %v726_v63 = vpop.permute.xlu0 %725  ;;  %v3943_v60 = vrot.slane %v947_v13, %v958_v57 }
 0x1d0   : > { %706 = vst [vmem:[#allocation3 + $0x58] sm:$0xf] %v700_v61  ;;  %2643 = vmatmul.mubr.msk.bf16.vlgmr.msra.gmra.mrb[0].mxu0 %vm816_vm0, %v3778_v44  ;;  %2726 = vmatprep.subr.bf16.mxu1 %v769_v62  ;;  %v730_v1 = vsel %vm727_vm7, %v724_v32, %v726_v63 }
 0x1d1   : > { %2727 = vmatpush3.bf16.msra.mxu1 %v769_v62  ;;  %875 = vmatprep.mubr.bf16.mxu0 %v3345_v0  ;;  %736 = vst [vmem:[#allocation3 + $0x58] sm:$0xf0] %v730_v1  ;;  %vm962_vm13 = vcmp.eq.s32.totalorder %v3943_v60, 1  ;;  %v3354_v60 = vmov 1983009808  }
 0x1d2   : > { %v752_v2 = vpop.permute.xlu1 %751  ;;  %vm3979_vm14 = vmpackc.low %vm962_vm13, %vm962_vm13 }
 0x1d3   : > { %v756_v3 = vsel %vm753_vm8, %v750_v42, %v752_v2  ;;  %v772_v4 = vld [vmem:[#allocation3 + $0x28] sm:$0xff] }
 0x1d4   : > { %762 = vst [vmem:[#allocation3 + $0x70] sm:$0xf] %v756_v3  ;;  %2728 = vmatprep.subr.bf16.mxu1 %v772_v4  ;;  %v775_v6 = vld [vmem:[#allocation3 + $0x40] sm:$0xff] }
 0x1d5   : > { %2729 = vmatpush3.bf16.msra.mxu1 %v772_v4 }
 0x1d6   : > { %2730 = vmatprep.subr.bf16.mxu1 %v775_v6 }
 0x1d8   : > { %2644 = vmatmul.mubr.msk.bf16.gmra.mrb[4].mxu0 %vm816_vm0, %v2933_v5  ;;  %v778_v44 = vld [vmem:[#allocation3 + $0x58] sm:$0xff] }
 0x1d9   : > { %2731 = vmatpush3.bf16.msra.mxu1 %v775_v6 }
 0x1da   : > { %2732 = vmatprep.subr.bf16.mxu1 %v778_v44 }
 0x1db   : > { %v781_v7 = vld [vmem:[#allocation3 + $0x70] sm:$0xf] }
 0x1dc   : > { %v831_v8 = vsel %vm823_vm9, %v781_v7, 0 }
 0x1dd   : > { %2733 = vmatpush3.bf16.msra.mxu1 %v778_v44 }
 0x1de   : > { %2778 = vmatprep.subr.msk.bf16.mxu1 %vm823_vm9, %v781_v7  ;;  %vm1515_vm9 = vcmask 261120  }
 0x1e0   : > { %v789_v15 = vpop.permute.xlu0 %788 }
 0x1e1   : > { %2735 = vmatpush3.bf16.msra.mxu1 %v831_v8 }
 0x1e3   : > { %v794_v21 = vpop.permute.xlu1 %793 }
 0x1e4   : > { %2737 = vmatmul.mubr.msk.bf16.vlgmr.msra.gmra.mrb[0].mxu1 %vm816_vm0, %v2933_v5  ;;  %v804_v41 = vpop.permute.xlu0 %803  ;;  %vm4141_vm0 = vmpackc.low %vm960_vm11, %vm960_vm11 }
 0x1e7   : > { %v799_v35 = vpop.permute.xlu1 %798 }
 0x2a3   : > { %v867_v16 = vpop.f32.mrb[0].mxu0 }
 0x2a4   : > { %v3862_v18 = vadd.f32 %v867_v16, %v789_v15  ;;  %v869_v19 = vpop.f32.mrb[1].mxu0 }
 0x2a5   : > { %v3866_v22 = vadd.f32 %v869_v19, %v789_v15  ;;  %v871_v23 = vpop.f32.mrb[2].mxu0  ;;  %v2936_v19 = vld [vmem:[#allocation14 + $0x4] ss:$12 sps:$4 sm:$0xff]  }
 0x2a6   : > { %v935_v24 = vmax.f32 %v3862_v18, 0.0  ;;  %v3869_v25 = vadd.f32 %v871_v23, %v794_v21  ;;  %v873_v26 = vpop.f32.mrb[3].mxu0  ;;  %1554 = vmatprep.mubr.bf16.mxu0 %v2936_v19  ;;  %1660 = vmatprep.mubr.bf16.mxu1 %v2936_v19 }
 0x2a7   : > { %v936_v27 = vmax.f32 %v3866_v22, 0.0  ;;  %v3873_v28 = vadd.f32 %v873_v26, %v794_v21  ;;  %v1012_v26 = vpop.permute.xlu0 %1011 }
 0x2a8   : > { %v938_v29 = vmax.f32 %v3869_v25, 0.0  ;;  %v963_v31 = vsel %vm960_vm11, %v935_v24, 0.0 }
 0x2a9   : > { %v939_v30 = vmax.f32 %v3873_v28, 0.0  ;;  %v964_v33 = vsel %vm961_vm12, %v936_v27, 0.0 }
 0x2aa   : > { %v966_v32 = vsel %vm960_vm11, %v938_v29, 0.0  ;;  %v2957_v22 = vpack.c.bf16 %v938_v29, %v935_v24 }
 0x2ab   : > { %v3890_v34 = vpack.c.bf16 %v966_v32, %v963_v31  ;;  %v967_v36 = vsel %vm961_vm12, %v939_v30, 0.0  ;;  %v877_v37 = vpop.f32.mrb[4].mxu0  ;;  %v1062_v32 = vpop.permute.xlu0 %1061 }
 0x2ac   : > { %v3896_v38 = vpack.c.bf16 %v967_v36, %v964_v33  ;;  %v3898_v39 = vadd.f32 %v877_v37, %v799_v35  ;;  %v879_v40 = vpop.f32.mrb[5].mxu0  ;;  %v1461_v33 = vld [vmem:[#allocation16] sm:$0xff] }
 0x2ad   : > { %v3900_v42 = vadd.f32 %v879_v40, %v799_v35  ;;  %v881_v43 = vpop.f32.mrb[6].mxu0  ;;  %1005 = vrot.lane.b32.xlu1 %v3890_v34, %s3346_s4 }
 0x2ae   : > { %v941_v45 = vmax.f32 %v3898_v39, 0.0  ;;  %v3905_v46 = vadd.f32 %v881_v43, %v804_v41  ;;  %v883_v47 = vpop.f32.mrb[7].mxu0  ;;  %1007 = vrot.lane.b32.xlu0 %v3896_v38, %s3346_s4 }
 0x2af   : > { %v942_v48 = vmax.f32 %v3900_v42, 0.0  ;;  %v3910_v49 = vadd.f32 %v883_v47, %v804_v41 }
 0x2b0   : > { %v944_v50 = vmax.f32 %v3905_v46, 0.0  ;;  %v969_v52 = vsel %vm960_vm11, %v941_v45, 0.0 }
 0x2b1   : > { %v945_v51 = vmax.f32 %v3910_v49, 0.0  ;;  %1055 = vrot.lane.b32.xlu1 %v3890_v34, %s3347_s30  ;;  %v970_v54 = vsel %vm961_vm12, %v942_v48, 0.0 }
 0x2b2   : > { %v972_v53 = vsel %vm960_vm11, %v944_v50, 0.0  ;;  %1057 = vrot.lane.b32.xlu0 %v3896_v38, %s3347_s30  ;;  %v2963_v18 = vpack.c.bf16 %v944_v50, %v941_v45 }
 0x2b3   : > { %v3930_v55 = vpack.c.bf16 %v972_v53, %v969_v52  ;;  %v973_v56 = vsel %vm961_vm12, %v945_v51, 0.0  ;;  %v1464_v52 = vld [vmem:[#allocation16 + $0x18] sm:$0xff]  ;;  %v2960_v28 = vpack.c.bf16 %v945_v51, %v942_v48 }
 0x2b4   : > { %v3937_v58 = vpack.c.bf16 %v973_v56, %v970_v54 }
 0x2b5   : > { %1105 = vrot.lane.b32.xlu1 %v3890_v34, %s3348_s25 }
 0x2b6   : > { %1107 = vrot.lane.b32.xlu0 %v3896_v38, %s3348_s25 }
 0x2b7   : > { %v2738_v59 = vpop.f32.mrb[0].mxu1 }
 0x2b8   : > { %v3945_v61 = vadd.f32 %v2738_v59, %v799_v35  ;;  %v920_v62 = vpop.f32.mrb[1].mxu1 }
 0x2b9   : > { %v921_v63 = vadd.f32 %v920_v62, %v789_v15  ;;  %v2739_v1 = vpop.f32.mrb[2].mxu1  ;;  %1015 = vrot.lane.b32.xlu1 %v3937_v58, %s3346_s4 }
 0x2ba   : > { %v943_v2 = vmax.f32 %v3945_v61, 0.0  ;;  %v3950_v3 = vadd.f32 %v2739_v1, %v804_v41  ;;  %v923_v4 = vpop.f32.mrb[3].mxu1  ;;  %1013 = vrot.lane.b32.xlu0 %v3930_v55, %s3346_s4  ;;  %v1462_v41 = vld [vmem:[#allocation16 + $0x8] sm:$0xff] }
 0x2bb   : > { %v937_v5 = vmax.f32 %v921_v63, 0.0  ;;  %v924_v6 = vadd.f32 %v923_v4, %v794_v21  ;;  %v1004_v21 = vpop.permute.xlu1 %1003 }
 0x2bc   : > { %v946_v44 = vmax.f32 %v3950_v3, 0.0  ;;  %v971_v8 = vsel %vm962_vm13, %v943_v2, 0.0 }
 0x2bd   : > { %v940_v7 = vmax.f32 %v924_v6, 0.0  ;;  %1155 = vrot.lane.b32.xlu1 %v3890_v34, %s3349_s27  ;;  %v965_v10 = vsel %vm962_vm13, %v937_v5, 0.0 }
 0x2be   : > { %v974_v9 = vsel %vm962_vm13, %v946_v44, 0.0  ;;  %1111 = vrot.lane.b32.xlu0 %v3345_v0, %s3348_s25 }
 0x2bf   : > { %v980_v12 = vpack.c.bf16 %v974_v9, %v971_v8  ;;  %v968_v13 = vsel %vm962_vm13, %v940_v7, 0.0  ;;  %v2951_v16 = vpack.c.bf16 %v940_v7, %v937_v5  ;;  %v1054_v23 = vpop.permute.xlu1 %1053 }
 0x2c0   : > { %v977_v14 = vpack.c.bf16 %v968_v13, %v965_v10 }
 0x2c1   : > { %1065 = vrot.lane.b32.xlu1 %v3937_v58, %s3347_s30  ;;  %2952 = vmatprep.subr.msk.bf16.mxu1 %vm3979_vm14, %v2951_v16 }
 0x2c2   : > { %1063 = vrot.lane.b32.xlu0 %v3930_v55, %s3347_s30 }
 0x2c3   : > { %v1104_v31 = vpop.permute.xlu1 %1103 }
 0x2c5   : > { %1153 = vrot.lane.b32.xlu1 %v3345_v0, %s3349_s27 }
 0x2c6   : > { %1113 = vrot.lane.b32.xlu0 %v3930_v55, %s3348_s25 }
 0x2c9   : > { %1115 = vrot.lane.b32.xlu1 %v3937_v58, %s3348_s25 }
 0x2ca   : > { %1157 = vrot.lane.b32.xlu0 %v3896_v38, %s3349_s27 }
 0x2cd   : > { %1217 = vrot.lane.b32.xlu1 %v3896_v38, %s3350_s3 }
 0x2ce   : > { %1163 = vrot.lane.b32.xlu0 %v3930_v55, %s3349_s27 }
 0x2d1   : > { %1165 = vrot.lane.b32.xlu1 %v3937_v58, %s3349_s27 }
 0x2d2   : > { %1161 = vrot.lane.b32.xlu0 %v3345_v0, %s3349_s27 }
 0x2d5   : > { %1215 = vrot.lane.b32.xlu1 %v3890_v34, %s3350_s3 }
 0x2d6   : > { %1219 = vrot.lane.b32.xlu0 %v977_v14, %s3350_s3 }
 0x2d9   : > { %1227 = vrot.lane.b32.xlu1 %v980_v12, %s3350_s3 }
 0x2da   : > { %1223 = vrot.lane.b32.xlu0 %v3930_v55, %s3350_s3 }
 0x2dd   : > { %1267 = vrot.lane.b32.xlu1 %v3896_v38, %s3351_s22 }
 0x2de   : > { %1269 = vrot.lane.b32.xlu0 %v977_v14, %s3351_s22 }
 0x2e1   : > { %1265 = vrot.lane.b32.xlu1 %v3890_v34, %s3351_s22 }
 0x2e2   : > { %1225 = vrot.lane.b32.xlu0 %v3937_v58, %s3350_s3 }
 0x2e5   : > { %1277 = vrot.lane.b32.xlu1 %v980_v12, %s3351_s22 }
 0x2e6   : > { %1273 = vrot.lane.b32.xlu0 %v3930_v55, %s3351_s22 }
 0x2e9   : > { %1317 = vrot.lane.b32.xlu1 %v3896_v38, %s3352_s28 }
 0x2ea   : > { %1275 = vrot.lane.b32.xlu0 %v3937_v58, %s3351_s22 }
 0x2ed   : > { %1315 = vrot.lane.b32.xlu1 %v3890_v34, %s3352_s28 }
 0x2ee   : > { %1319 = vrot.lane.b32.xlu0 %v977_v14, %s3352_s28 }
 0x2f1   : > { %1327 = vrot.lane.b32.xlu1 %v980_v12, %s3352_s28 }
 0x2f2   : > { %1325 = vrot.lane.b32.xlu0 %v3937_v58, %s3352_s28 }
 0x2f5   : > { %1367 = vrot.lane.b32.xlu1 %v3896_v38, %s3353_s23  ;;  %v1463_v38 = vld [vmem:[#allocation16 + $0x10] sm:$0xff] }
 0x2f6   : > { %1323 = vrot.lane.b32.xlu0 %v3930_v55, %s3352_s28 }
 0x2f9   : > { %1365 = vrot.lane.b32.xlu1 %v3890_v34, %s3353_s23 }
 0x2fa   : > { %1369 = vrot.lane.b32.xlu0 %v977_v14, %s3353_s23 }
 0x2fd   : > { %1377 = vrot.lane.b32.xlu1 %v980_v12, %s3353_s23 }
 0x2fe   : > { %1375 = vrot.lane.b32.xlu0 %v3937_v58, %s3353_s23 }
 0x301   : > { %1373 = vrot.lane.b32.xlu1 %v3930_v55, %s3353_s23 }
 0x302   : > { %1009 = vrot.lane.b32.xlu0 %v977_v14, %s3346_s4 }
 0x305   : > { %1221 = vrot.lane.b32.xlu1 %v3345_v0, %s3350_s3 }
 0x306   : > { %1017 = vrot.lane.b32.xlu0 %v980_v12, %s3346_s4 }
 0x309   : > { %1229 = vrot.lane.b32.xlu1 %v3345_v0, %s3350_s3 }
 0x30a   : > { %1059 = vrot.lane.b32.xlu0 %v977_v14, %s3347_s30 }
 0x30d   : > { %1271 = vrot.lane.b32.xlu1 %v3345_v0, %s3351_s22 }
 0x30e   : > { %1067 = vrot.lane.b32.xlu0 %v980_v12, %s3347_s30 }
 0x311   : > { %1279 = vrot.lane.b32.xlu1 %v3345_v0, %s3351_s22 }
 0x312   : > { %1109 = vrot.lane.b32.xlu0 %v977_v14, %s3348_s25 }
 0x315   : > { %1321 = vrot.lane.b32.xlu1 %v3345_v0, %s3352_s28 }
 0x316   : > { %1117 = vrot.lane.b32.xlu0 %v980_v12, %s3348_s25 }
 0x319   : > { %1329 = vrot.lane.b32.xlu1 %v3345_v0, %s3352_s28 }
 0x31a   : > { %1159 = vrot.lane.b32.xlu0 %v977_v14, %s3349_s27 }
 0x31d   : > { %1371 = vrot.lane.b32.xlu1 %v3345_v0, %s3353_s23 }
 0x31e   : > { %1167 = vrot.lane.b32.xlu0 %v980_v12, %s3349_s27 }
 0x31f   : > { %v1006_v34 = vpop.permute.xlu1 %1005 }
 0x320   : > { %v4061_v35 = vpop.permute.xlu0 %1007  ;;  %v1019_v37 = vsel %vm549_vm1, %v1004_v21, %v1006_v34 }
 0x321   : > { %v1020_v36 = vsel %vm549_vm1, %v1006_v34, %v4061_v35  ;;  %1467 = vperm.xlu1 %2928, %v1461_v33  }
 0x322   : > { %1379 = vrot.lane.b32.xlu0 %v3345_v0, %s3353_s23  ;;  %1522 = vmatprep.subr.bf16.mxu0 %v1020_v36 }
 0x323   : > { %v1056_v40 = vpop.permute.xlu1 %1055  ;;  %1523 = vmatpush1.bf16.msra.mxu0 %v1019_v37 }
 0x324   : > { %v4068_v43 = vpop.permute.xlu0 %1057  ;;  %v1069_v63 = vsel %vm579_vm2, %v1054_v23, %v1056_v40 }
 0x325   : > { %1477 = vperm.xlu1 %2928, %v1463_v38   ;;  %v1070_v58 = vsel %vm579_vm2, %v1056_v40, %v4068_v43  ;;  %v2954_v38 = vpack.c.bf16 %v939_v30, %v936_v27 }
 0x326   : > { %1472 = vperm.xlu0 %2927, %v1462_v41  }
 0x327   : > { %v1106_v47 = vpop.permute.xlu1 %1105 }
 0x328   : > { %v4070_v53 = vpop.permute.xlu0 %1107  ;;  %v1119_v10 = vsel %vm605_vm3, %v1104_v31, %v1106_v47 }
 0x329   : > { %1778 = vrot.lane.b32.xlu1 %v3345_v0, %s3346_s4  ;;  %v1120_v7 = vsel %vm605_vm3, %v1106_v47, %v4070_v53 }
 0x32a   : > { %1482 = vperm.xlu0 %2927, %v1464_v52  }
 0x32b   : > { %v4074_v54 = vpop.permute.xlu1 %1015 }
 0x32c   : > { %v1014_v55 = vpop.permute.xlu0 %1013 }
 0x32d   : > { %v1022_v56 = vsel %vm549_vm1, %v1012_v26, %v1014_v55  ;;  %v1023_v57 = vsel %vm549_vm1, %v1014_v55, %v4074_v54  ;;  %1828 = vrot.lane.b32.xlu1 %v3345_v0, %s3347_s30 }
 0x32e   : > { %1524 = vmatprep.subr.bf16.mxu0 %v1023_v57  ;;  %1786 = vrot.lane.b32.xlu0 %v3345_v0, %s3346_s4 }
 0x32f   : > { %v1156_v59 = vpop.permute.xlu1 %1155  ;;  %1525 = vmatpush1.bf16.msra.mxu0 %v1022_v56 }
 0x330   : > { %v1112_v62 = vpop.permute.xlu0 %1111  ;;  %1526 = vmatprep.subr.bf16.mxu0 %v1070_v58 }
 0x331   : > { %1878 = vrot.lane.b32.xlu1 %v3345_v0, %s3348_s25 }
 0x332   : > { %1836 = vrot.lane.b32.xlu0 %v3345_v0, %s3347_s30 }
 0x333   : > { %v4090_v1 = vpop.permute.xlu1 %1065  ;;  %1527 = vmatpush1.bf16.msra.mxu0 %v1069_v63 }
 0x334   : > { %v1064_v4 = vpop.permute.xlu0 %1063 }
 0x335   : > { %v1072_v5 = vsel %vm579_vm2, %v1062_v32, %v1064_v4  ;;  %v1073_v6 = vsel %vm579_vm2, %v1064_v4, %v4090_v1  ;;  %1928 = vrot.lane.b32.xlu1 %v3345_v0, %s3349_s27 }
 0x336   : > { %1528 = vmatprep.subr.bf16.mxu0 %v1073_v6  ;;  %1886 = vrot.lane.b32.xlu0 %v3345_v0, %s3348_s25 }
 0x337   : > { %v1154_v8 = vpop.permute.xlu1 %1153  ;;  %1529 = vmatpush1.bf16.msra.mxu0 %v1072_v5 }
 0x338   : > { %v1114_v9 = vpop.permute.xlu0 %1113  ;;  %1530 = vmatprep.subr.bf16.mxu0 %v1120_v7 }
 0x339   : > { %1996 = vrot.lane.b32.xlu1 %v3345_v0, %s3350_s3  ;;  %v1122_v16 = vsel %vm605_vm3, %v1112_v62, %v1114_v9 }
 0x33a   : > { %1936 = vrot.lane.b32.xlu0 %v3345_v0, %s3349_s27  ;;  %v1169_v0 = vsel %vm635_vm4, %v1154_v8, %v1156_v59 }
 0x33b   : > { %v4106_v12 = vpop.permute.xlu1 %1115  ;;  %1531 = vmatpush1.bf16.msra.mxu0 %v1119_v10  ;;  %v4191_v10 = vld [vmem:[#allocation14 + $0x1c] ss:$12 sps:$4 sm:$0xff]  }
 0x33c   : > { %v1123_v13 = vsel %vm605_vm3, %v1114_v9, %v4106_v12  ;;  %v4110_v14 = vpop.permute.xlu0 %1157  ;;  %v4189_v9 = vld [vmem:[#allocation14] ss:$12 sps:$4 sm:$0xff]  }
 0x33d   : > { %1532 = vmatprep.subr.bf16.mxu0 %v1123_v13  ;;  %v1170_v19 = vsel %vm635_vm4, %v1156_v59, %v4110_v14 }
 0x33f   : > { %v1218_v21 = vpop.permute.xlu1 %1217  ;;  %1533 = vmatpush1.bf16.msra.mxu0 %v1122_v16 }
 0x340   : > { %v1164_v23 = vpop.permute.xlu0 %1163  ;;  %1534 = vmatprep.subr.bf16.mxu0 %v1170_v19 }
 0x343   : > { %v4116_v26 = vpop.permute.xlu1 %1165  ;;  %1535 = vmatpush1.bf16.msra.mxu0 %v1169_v0 }
 0x344   : > { %v1173_v31 = vsel %vm635_vm4, %v1164_v23, %v4116_v26  ;;  %v1162_v32 = vpop.permute.xlu0 %1161 }
 0x345   : > { %v1172_v33 = vsel %vm635_vm4, %v1162_v32, %v1164_v23  ;;  %1536 = vmatprep.subr.bf16.mxu0 %v1173_v31  ;;  %v4204_v32 = vld [vmem:[#allocation14 + $0x18] ss:$12 sps:$4 sm:$0xff]  }
 0x347   : > { %v1216_v34 = vpop.permute.xlu1 %1215  ;;  %1537 = vmatpush1.bf16.msra.mxu0 %v1172_v33 }
 0x348   : > { %v4121_v36 = vpop.permute.xlu0 %1219  ;;  %2955 = vmatprep.subr.msk.bf16.mxu0 %vm4126_vm15, %v2954_v38  ;;  %v1231_v25 = vsel %vm671_vm5, %v1216_v34, %v1218_v21 }
 0x349   : > { %v1232_v30 = vsel %vm671_vm5, %v1218_v21, %v4121_v36 }
 0x34b   : > { %v4136_v40 = vpop.permute.xlu1 %1227  ;;  %2958 = vmatpush1.bf16.msk.msra.mxu0 %vm4141_vm0, %v2957_v22 }
 0x34c   : > { %v1224_v27 = vpop.permute.xlu0 %1223  ;;  %2961 = vmatprep.subr.msk.bf16.mxu0 %vm4126_vm15, %v2960_v28  ;;  %v2966_v28 = vpack.c.bf16 %v946_v44, %v943_v2 }
 0x34f   : > { %v1268_v47 = vpop.permute.xlu1 %1267  ;;  %2964 = vmatpush1.bf16.msk.msra.mxu0 %vm4141_vm0, %v2963_v18  ;;  %v2940_v18 = vld [vmem:[#allocation14 + $0x8] ss:$12 sps:$4 sm:$0xff]  }
 0x350   : > { %v4165_v24 = vpop.permute.xlu0 %1269  ;;  %1542 = vmatprep.subr.bf16.mxu0 %v1232_v30  ;;  %v4216_v30 = vld [vmem:[#allocation2] sm:$0xff] }
 0x351   : > { %v1282_v39 = vsel %vm697_vm6, %v1268_v47, %v4165_v24 }
 0x353   : > { %v1266_v29 = vpop.permute.xlu1 %1265  ;;  %1543 = vmatpush1.bf16.msra.mxu0 %v1231_v25 }
 0x354   : > { %v1226_v42 = vpop.permute.xlu0 %1225  ;;  %v1281_v50 = vsel %vm697_vm6, %v1266_v29, %v1268_v47 }
 0x355   : > { %v1234_v48 = vsel %vm671_vm5, %v1224_v27, %v1226_v42  ;;  %v1235_v49 = vsel %vm671_vm5, %v1226_v42, %v4136_v40  ;;  %v2941_v42 = vld [vmem:[#allocation14 + $0x20] ss:$12 sps:$4 sm:$0xff]  }
 0x356   : > { %1544 = vmatprep.subr.bf16.mxu0 %v1235_v49 }
 0x357   : > { %v4173_v45 = vpop.permute.xlu1 %1277  ;;  %1545 = vmatpush1.bf16.msra.mxu0 %v1234_v48 }
 0x358   : > { %v1274_v46 = vpop.permute.xlu0 %1273  ;;  %1546 = vmatprep.subr.bf16.mxu0 %v1282_v39 }
 0x35b   : > { %v1318_v51 = vpop.permute.xlu1 %1317  ;;  %1547 = vmatpush1.bf16.msra.mxu0 %v1281_v50 }
 0x35c   : > { %v1276_v52 = vpop.permute.xlu0 %1275 }
 0x35d   : > { %v1284_v55 = vsel %vm697_vm6, %v1274_v46, %v1276_v52  ;;  %v1285_v56 = vsel %vm697_vm6, %v1276_v52, %v4173_v45 }
 0x35e   : > { %1548 = vmatprep.subr.bf16.mxu0 %v1285_v56 }
 0x35f   : > { %v1316_v57 = vpop.permute.xlu1 %1315  ;;  %1549 = vmatpush1.bf16.msra.mxu0 %v1284_v55 }
 0x360   : > { %v4179_v58 = vpop.permute.xlu0 %1319  ;;  %v1331_v62 = vsel %vm727_vm7, %v1316_v57, %v1318_v51 }
 0x361   : > { %v1332_v59 = vsel %vm727_vm7, %v1318_v51, %v4179_v58 }
 0x362   : > { %1550 = vmatprep.subr.bf16.mxu0 %v1332_v59 }
 0x363   : > { %v4184_v63 = vpop.permute.xlu1 %1327  ;;  %1551 = vmatpush1.bf16.msra.mxu0 %v1331_v62 }
 0x364   : > { %v1326_v4 = vpop.permute.xlu0 %1325 }
 0x365   : > { %v1335_v5 = vsel %vm727_vm7, %v1326_v4, %v4184_v63 }
 0x366   : > { %1552 = vmatprep.subr.bf16.mxu0 %v1335_v5 }
 0x367   : > { %v1368_v6 = vpop.permute.xlu1 %1367 }
 0x368   : > { %v1324_v7 = vpop.permute.xlu0 %1323 }
 0x369   : > { %v1334_v8 = vsel %vm727_vm7, %v1324_v7, %v1326_v4 }
 0x36a   : > { %1553 = vmatpush1.bf16.msra.mxu0 %v1334_v8 }
 0x36b   : > { %v1366_v13 = vpop.permute.xlu1 %1365 }
 0x36c   : > { %v4193_v16 = vpop.permute.xlu0 %1369  ;;  %v1381_v21 = vsel %vm753_vm8, %v1366_v13, %v1368_v6 }
 0x36d   : > { %v1382_v19 = vsel %vm753_vm8, %v1368_v6, %v4193_v16  ;;  %1555 = vmatmul.mubr.bf16.vlgmr.msra.gmra.mrb[8].mxu0 %v4189_v9 }
 0x36e   : > { %1575 = vmatprep.subr.bf16.mxu0 %v1382_v19  ;;  %1564 = vmatprep.mubr.bf16.mxu0 %v4191_v10 }
 0x36f   : > { %v4200_v23 = vpop.permute.xlu1 %1377  ;;  %1576 = vmatpush1.bf16.msra.mxu0 %v1381_v21 }
 0x370   : > { %v1376_v0 = vpop.permute.xlu0 %1375 }
 0x371   : > { %v1385_v31 = vsel %vm753_vm8, %v1376_v0, %v4200_v23 }
 0x372   : > { %1577 = vmatprep.subr.bf16.mxu0 %v1385_v31 }
 0x373   : > { %v1374_v33 = vpop.permute.xlu1 %1373 }
 0x374   : > { %v1384_v34 = vsel %vm753_vm8, %v1374_v33, %v1376_v0  ;;  %v1010_v38 = vpop.permute.xlu0 %1009 }
 0x375   : > { %v1021_v22 = vsel %vm549_vm1, %v4061_v35, %v1010_v38  ;;  %1565 = vmatmul.mubr.bf16.gmra.mrb[12].mxu0 %v4204_v32 }
 0x376   : > { %1578 = vmatpush1.bf16.msra.mxu0 %v1384_v34  ;;  %2670 = vmatpush3.bf16.msra.mxu1 %v1021_v22 }
 0x377   : > { %v1222_v27 = vpop.permute.xlu1 %1221  ;;  %2967 = vmatprep.subr.msk.bf16.mxu1 %vm3979_vm14, %v2966_v28  ;;  %1607 = vmatprep.mubr.bf16.mxu0 %v4216_v30 }
 0x378   : > { %v1018_v47 = vpop.permute.xlu0 %1017  ;;  %v1233_v25 = vsel %vm671_vm5, %v4121_v36, %v1222_v27 }
 0x379   : > { %v1024_v35 = vsel %vm549_vm1, %v4074_v54, %v1018_v47 }
 0x37a   : > { %2672 = vmatpush3.bf16.msra.mxu1 %v1024_v35 }
 0x37b   : > { %v1230_v61 = vpop.permute.xlu1 %1229  ;;  %2673 = vmatprep.subr.bf16.mxu1 %v1233_v25 }
 0x37c   : > { %v1060_v2 = vpop.permute.xlu0 %1059  ;;  %v1236_v44 = vsel %vm671_vm5, %v4136_v40, %v1230_v61 }
 0x37d   : > { %v1071_v3 = vsel %vm579_vm2, %v4068_v43, %v1060_v2  ;;  %2653 = vmatmul.mubr.msk.bf16.vlgmr.msra.gmra.mrb[8].mxu0 %vm1515_vm9, %v2940_v18 }
 0x37e   : > { %2674 = vmatpush3.bf16.msra.mxu1 %v1071_v3  ;;  %1617 = vmatprep.mubr.bf16.mxu0 %v4216_v30 }
 0x37f   : > { %v1272_v54 = vpop.permute.xlu1 %1271  ;;  %2675 = vmatprep.subr.bf16.mxu1 %v1236_v44 }
 0x380   : > { %v1068_v29 = vpop.permute.xlu0 %1067  ;;  %v1283_v48 = vsel %vm697_vm6, %v4165_v24, %v1272_v54 }
 0x381   : > { %v1074_v36 = vsel %vm579_vm2, %v4090_v1, %v1068_v29 }
 0x382   : > { %2676 = vmatpush3.bf16.msra.mxu1 %v1074_v36 }
 0x383   : > { %v1280_v43 = vpop.permute.xlu1 %1279  ;;  %2677 = vmatprep.subr.bf16.mxu1 %v1283_v48 }
 0x384   : > { %v1110_v49 = vpop.permute.xlu0 %1109  ;;  %v1286_v39 = vsel %vm697_vm6, %v4173_v45, %v1280_v43 }
 0x385   : > { %v1121_v40 = vsel %vm605_vm3, %v4070_v53, %v1110_v49  ;;  %2654 = vmatmul.mubr.msk.bf16.gmra.mrb[12].mxu0 %vm1515_vm9, %v2941_v42 }
 0x386   : > { %2678 = vmatpush3.bf16.msra.mxu1 %v1121_v40 }
 0x387   : > { %v1322_v46 = vpop.permute.xlu1 %1321  ;;  %2679 = vmatprep.subr.bf16.mxu1 %v1286_v39 }
 0x388   : > { %v1118_v1 = vpop.permute.xlu0 %1117  ;;  %v1333_v24 = vsel %vm727_vm7, %v4179_v58, %v1322_v46 }
 0x389   : > { %v1124_v50 = vsel %vm605_vm3, %v4106_v12, %v1118_v1 }
 0x38a   : > { %2680 = vmatpush3.bf16.msra.mxu1 %v1124_v50 }
 0x38b   : > { %v1330_v51 = vpop.permute.xlu1 %1329  ;;  %2681 = vmatprep.subr.bf16.mxu1 %v1333_v24 }
 0x38c   : > { %v1160_v52 = vpop.permute.xlu0 %1159  ;;  %v1336_v45 = vsel %vm727_vm7, %v4184_v63, %v1330_v51 }
 0x38d   : > { %v1171_v53 = vsel %vm635_vm4, %v4110_v14, %v1160_v52 }
 0x38e   : > { %2682 = vmatpush3.bf16.msra.mxu1 %v1171_v53 }
 0x38f   : > { %v1372_v55 = vpop.permute.xlu1 %1371  ;;  %2683 = vmatprep.subr.bf16.mxu1 %v1336_v45 }
 0x390   : > { %v1168_v56 = vpop.permute.xlu0 %1167  ;;  %v1383_v57 = vsel %vm753_vm8, %v4193_v16, %v1372_v55 }
 0x391   : > { %v1174_v12 = vsel %vm635_vm4, %v4116_v26, %v1168_v56 }
 0x392   : > { %2684 = vmatpush3.bf16.msra.mxu1 %v1174_v12 }
 0x393   : > { %2740 = vmatprep.subr.bf16.mxu1 %v1383_v57 }
 0x394   : > { %v1380_v58 = vpop.permute.xlu0 %1379 }
 0x395   : > { %v1386_v59 = vsel %vm753_vm8, %v4200_v23, %v1380_v58  ;;  %1661 = vmatmul.mubr.bf16.vlgmr.msra.gmra.mrb[4].mxu1 %v4189_v9 }
 0x396   : > { %2741 = vmatpush3.bf16.msra.mxu1 %v1383_v57  ;;  %1668 = vmatprep.mubr.bf16.mxu1 %v4191_v10 }
 0x397   : > { %2742 = vmatprep.subr.bf16.mxu1 %v1386_v59 }
 0x39a   : > { %2743 = vmatpush3.bf16.msra.mxu1 %v1386_v59 }
 0x39d   : > { %1669 = vmatmul.mubr.bf16.gmra.mrb[8].mxu1 %v4204_v32 }
 0x39e   : > { %2744 = vmatprep.mubr.msk.bf16.mxu1 %vm1515_vm9, %v2940_v18 }
 0x3a0   : > { %v1468_v14 = vpop.permute.xlu1 %1467 }
 0x3a4   : > { %v1478_v0 = vpop.permute.xlu1 %1477 }
 0x3a5   : > { %2745 = vmatmul.mubr.msk.bf16.vlgmr.msra.gmra.mrb[12].mxu1 %vm1515_vm9, %v2941_v42  ;;  %v1473_v4 = vpop.permute.xlu0 %1472 }
 0x3a9   : > { %v1483_v28 = vpop.permute.xlu0 %1482 }
 0x450   : > { %v1609_v26 = vpop.f32.mrb[8].mxu0 }
 0x451   : > { %v4257_v62 = vadd.f32 %v1609_v26, %v1468_v14  ;;  %v1611_v63 = vpop.f32.mrb[9].mxu0 }
 0x452   : > { %v4259_v5 = vadd.f32 %v1611_v63, %v1468_v14  ;;  %v1613_v6 = vpop.f32.mrb[10].mxu0 }
 0x453   : > { %v1726_v7 = vmax.f32 %v4257_v62, 0.0  ;;  %v4262_v8 = vadd.f32 %v1613_v6, %v1473_v4  ;;  %v1615_v9 = vpop.f32.mrb[11].mxu0 }
 0x454   : > { %v1727_v10 = vmax.f32 %v4259_v5, 0.0  ;;  %v4265_v13 = vadd.f32 %v1615_v9, %v1473_v4 }
 0x455   : > { %v1729_v16 = vmax.f32 %v4262_v8, 0.0  ;;  %v1738_v21 = vsel %vm960_vm11, %v1726_v7, 0.0 }
 0x456   : > { %v1730_v19 = vmax.f32 %v4265_v13, 0.0  ;;  %v1739_v31 = vsel %vm961_vm12, %v1727_v10, 0.0 }
 0x457   : > { %v1741_v23 = vsel %vm960_vm11, %v1729_v16, 0.0 }
 0x458   : > { %v4281_v32 = vpack.c.bf16 %v1741_v23, %v1738_v21  ;;  %v1742_v33 = vsel %vm961_vm12, %v1730_v19, 0.0  ;;  %v1619_v34 = vpop.f32.mrb[12].mxu0 }
 0x459   : > { %v4287_v38 = vpack.c.bf16 %v1742_v33, %v1739_v31  ;;  %v4289_v22 = vadd.f32 %v1619_v34, %v1478_v0  ;;  %v1621_v27 = vpop.f32.mrb[13].mxu0 }
 0x45a   : > { %1756 = vst [vmem:[#allocation2 + $0x8] sm:$0xff] %v4281_v32  ;;  %v4292_v47 = vadd.f32 %v1621_v27, %v1478_v0  ;;  %v1623_v35 = vpop.f32.mrb[14].mxu0 }
 0x45b   : > { %1757 = vst [vmem:[#allocation2 + $0x10] sm:$0xff] %v4287_v38  ;;  %v1732_v18 = vmax.f32 %v4289_v22, 0.0  ;;  %v4296_v25 = vadd.f32 %v1623_v35, %v1483_v28  ;;  %v1625_v61 = vpop.f32.mrb[15].mxu0 }
 0x45c   : > { %v1733_v2 = vmax.f32 %v4292_v47, 0.0  ;;  %v4299_v3 = vadd.f32 %v1625_v61, %v1483_v28 }
 0x45d   : > { %v1735_v44 = vmax.f32 %v4296_v25, 0.0  ;;  %v1744_v29 = vsel %vm960_vm11, %v1732_v18, 0.0 }
 0x45e   : > { %v1736_v54 = vmax.f32 %v4299_v3, 0.0  ;;  %v1745_v42 = vsel %vm961_vm12, %v1733_v2, 0.0 }
 0x45f   : > { %v1747_v36 = vsel %vm960_vm11, %v1735_v44, 0.0  ;;  %v2984_v62 = vpack.c.bf16 %v1735_v44, %v1732_v18 }
 0x460   : > { %v4315_v48 = vpack.c.bf16 %v1747_v36, %v1744_v29  ;;  %v1748_v43 = vsel %vm961_vm12, %v1736_v54, 0.0  ;;  %v2238_v36 = vunpack.c.l.s4 %v3354_v60 }
 0x461   : > { %v4321_v49 = vpack.c.bf16 %v1748_v43, %v1745_v42 }
 0x462   : > { %v2239_v42 = vunpack.c.0.s8 %v2238_v36 }
 0x464   : > { %v2242_v43 = vsub.s32 %v2239_v42, %v3855_v11  ;;  %v1779_v11 = vpop.permute.xlu1 %1778 }
 0x468   : > { %v2685_v40 = vpop.f32.mrb[4].mxu1 }
 0x469   : > { %v2686_v39 = vpop.f32.mrb[5].mxu1 }
 0x46a   : > { %v2687_v46 = vadd.f32 %v2686_v39, %v2685_v40  ;;  %v2688_v1 = vpop.f32.mrb[6].mxu1  ;;  %v2174_v40 = vld [vmem:[#allocation17] sm:$0x3f] }
 0x46b   : > { %v2689_v17 = vpop.f32.mrb[7].mxu1  ;;  %v4427_v39 = vrot.slane %v2174_v40, %v2242_v43 }
 0x46c   : > { %v2690_v50 = vadd.f32 %v2689_v17, %v2688_v1  ;;  %v1663_v57 = vadd.f32 %v2687_v46, %v1468_v14  ;;  %v1829_v1 = vpop.permute.xlu1 %1828  ;;  %v4445_v17 = vpop.permute.xlu0 %1786 }
 0x46d   : > { %v2251_v46 = vcombine.high %v4427_v39, %v4427_v39 }
 0x46e   : > { %v1666_v6 = vadd.f32 %v2690_v50, %v1473_v4  ;;  %v2236_v50 = vcombine.high %v2174_v40, %v2174_v40 }
 0x46f   : > { %2371 = vmatprep.mubr.bf16.mxu0 %v2251_v46  ;;  %2289 = vmatprep.mubr.bf16.mxu1 %v2251_v46 }
 0x470   : > { %v2691_v24 = vpop.f32.mrb[8].mxu1 }
 0x471   : > { %v2692_v51 = vpop.f32.mrb[9].mxu1 }
 0x472   : > { %v2693_v52 = vadd.f32 %v2692_v51, %v2691_v24  ;;  %v2694_v53 = vpop.f32.mrb[10].mxu1  ;;  %v1879_v24 = vpop.permute.xlu1 %1878  ;;  %v4453_v51 = vrot.slane %v2236_v50, %v2242_v43 }
 0x473   : > { %v2695_v45 = vpop.f32.mrb[11].mxu1 }
 0x474   : > { %v2696_v55 = vadd.f32 %v2695_v45, %v2694_v53  ;;  %v1671_v56 = vadd.f32 %v2693_v52, %v1478_v0  ;;  %v4457_v52 = vpop.permute.xlu0 %1836 }
 0x476   : > { %v1674_v59 = vadd.f32 %v2696_v55, %v1483_v28 }
 0x478   : > { %v2746_v12 = vpop.f32.mrb[12].mxu1  ;;  %v4463_v53 = vpop.permute.xlu0 %1886 }
 0x479   : > { %v4323_v58 = vadd.f32 %v2746_v12, %v1671_v56  ;;  %v1711_v20 = vpop.f32.mrb[13].mxu1 }
 0x47a   : > { %v1712_v26 = vadd.f32 %v1711_v20, %v1663_v57  ;;  %v2747_v63 = vpop.f32.mrb[14].mxu1 }
 0x47b   : > { %v1734_v9 = vmax.f32 %v4323_v58, 0.0  ;;  %v4326_v21 = vadd.f32 %v2747_v63, %v1674_v59  ;;  %v1714_v23 = vpop.f32.mrb[15].mxu1 }
 0x47c   : > { %v1728_v31 = vmax.f32 %v1712_v26, 0.0  ;;  %v1715_v33 = vadd.f32 %v1714_v23, %v1666_v6  ;;  %v4471_v55 = vpop.permute.xlu0 %1936 }
 0x47d   : > { %v1737_v34 = vmax.f32 %v4326_v21, 0.0  ;;  %v1746_v14 = vsel %vm962_vm13, %v1734_v9, 0.0 }
 0x47e   : > { %v1731_v27 = vmax.f32 %v1715_v33, 0.0  ;;  %v1740_v0 = vsel %vm962_vm13, %v1728_v31, 0.0 }
 0x47f   : > { %v1749_v4 = vsel %vm962_vm13, %v1737_v34, 0.0  ;;  %v2972_v63 = vpack.c.bf16 %v1737_v34, %v1734_v9 }
 0x480   : > { %v4339_v28 = vpack.c.bf16 %v1749_v4, %v1746_v14  ;;  %v1743_v35 = vsel %vm962_vm13, %v1731_v27, 0.0  ;;  %v2969_v29 = vpack.c.bf16 %v1731_v27, %v1728_v31 }
 0x481   : > { %v4343_v61 = vpack.c.bf16 %v1743_v35, %v1740_v0 }
 0x482   : > { %1792 = vrot.lane.b32.xlu1 %v4339_v28, %s3346_s4  ;;  %2970 = vmatprep.subr.msk.bf16.mxu0 %vm3979_vm14, %v2969_v29 }
 0x483   : > { %1758 = vst [vmem:[#allocation2 + $0x18] sm:$0xff] %v4343_v61  ;;  %1834 = vrot.lane.b32.xlu0 %v4343_v61, %s3347_s30 }
 0x486   : > { %2002 = vrot.lane.b32.xlu1 %v4339_v28, %s3350_s3 }
 0x487   : > { %1990 = vrot.lane.b32.xlu0 %v4281_v32, %s3350_s3 }
 0x48a   : > { %1784 = vrot.lane.b32.xlu1 %v4343_v61, %s3346_s4 }
 0x48b   : > { %1782 = vrot.lane.b32.xlu0 %v4287_v38, %s3346_s4 }
 0x48e   : > { %1994 = vrot.lane.b32.xlu1 %v4343_v61, %s3350_s3 }
 0x48f   : > { %1832 = vrot.lane.b32.xlu0 %v4287_v38, %s3347_s30 }
 0x492   : > { %1780 = vrot.lane.b32.xlu1 %v4281_v32, %s3346_s4 }
 0x493   : > { %1882 = vrot.lane.b32.xlu0 %v4287_v38, %s3348_s25 }
 0x496   : > { %1830 = vrot.lane.b32.xlu1 %v4281_v32, %s3347_s30 }
 0x497   : > { %1932 = vrot.lane.b32.xlu0 %v4287_v38, %s3349_s27 }
 0x49a   : > { %1880 = vrot.lane.b32.xlu1 %v4281_v32, %s3348_s25 }
 0x49b   : > { %1992 = vrot.lane.b32.xlu0 %v4287_v38, %s3350_s3 }
 0x49e   : > { %1930 = vrot.lane.b32.xlu1 %v4281_v32, %s3349_s27 }
 0x49f   : > { %1788 = vrot.lane.b32.xlu0 %v4315_v48, %s3346_s4 }
 0x4a2   : > { %1790 = vrot.lane.b32.xlu1 %v4321_v49, %s3346_s4  ;;  %s2784_s4 = smul.u32 192, %s3439_s20 }
 0x4a3   : > { %1838 = vrot.lane.b32.xlu0 %v4315_v48, %s3347_s30 }
 0x4a6   : > { %2042 = vrot.lane.b32.xlu1 %v4287_v38, %s3351_s22 }
 0x4a7   : > { %1888 = vrot.lane.b32.xlu0 %v4315_v48, %s3348_s25 }
 0x4aa   : > { %1840 = vrot.lane.b32.xlu1 %v4321_v49, %s3347_s30 }
 0x4ab   : > { %1938 = vrot.lane.b32.xlu0 %v4315_v48, %s3349_s27 }
 0x4ae   : > { %2040 = vrot.lane.b32.xlu1 %v4281_v32, %s3351_s22 }
 0x4af   : > { %1998 = vrot.lane.b32.xlu0 %v4315_v48, %s3350_s3 }
 0x4b2   : > { %1890 = vrot.lane.b32.xlu1 %v4321_v49, %s3348_s25 }
 0x4b3   : > { %2044 = vrot.lane.b32.xlu0 %v4343_v61, %s3351_s22 }
 0x4b6   : > { %1842 = vrot.lane.b32.xlu1 %v4339_v28, %s3347_s30  ;;  %s509_s30 = scalar_lea.vmem [#allocation20], %s3721_s11  ;;  %s3359_s11 = smov [#allocation20]  }
 0x4b7   : > { %2004 = vrot.lane.b32.xlu0 %v4216_v30, %s3350_s3 }
 0x4ba   : > { %1940 = vrot.lane.b32.xlu1 %v4321_v49, %s3349_s27 }
 0x4bb   : > { %2048 = vrot.lane.b32.xlu0 %v4315_v48, %s3351_s22 }
 0x4be   : > { %2052 = vrot.lane.b32.xlu1 %v4339_v28, %s3351_s22 }
 0x4bf   : > { %1884 = vrot.lane.b32.xlu0 %v4343_v61, %s3348_s25 }
 0x4c2   : > { %2046 = vrot.lane.b32.xlu1 %v4216_v30, %s3351_s22 }
 0x4c3   : > { %2094 = vrot.lane.b32.xlu0 %v4343_v61, %s3352_s28 }
 0x4c6   : > { %2092 = vrot.lane.b32.xlu1 %v4287_v38, %s3352_s28 }
 0x4c7   : > { %2054 = vrot.lane.b32.xlu0 %v4216_v30, %s3351_s22 }
 0x4ca   : > { %2090 = vrot.lane.b32.xlu1 %v4281_v32, %s3352_s28 }
 0x4cb   : > { %2098 = vrot.lane.b32.xlu0 %v4315_v48, %s3352_s28 }
 0x4ce   : > { %1892 = vrot.lane.b32.xlu1 %v4339_v28, %s3348_s25  ;;  %s2458_s25 = sshll.u32 %s509_s30, 4  ;;  %s4594_s25 = int_to_ptr.vmem [resolvable:$true] %s2458_s25 }
 0x4cf   : > { %2000 = vrot.lane.b32.xlu0 %v4321_v49, %s3350_s3  ;;  %s3242_s20 = scalar_lea.vmem %s4594_s25, 192 }
 0x4d0   : > { %p3243_p7 = scmp.ne.s32.totalorder %s4594_s25, %s3242_s20 }
 0x4d2   : > { %2102 = vrot.lane.b32.xlu1 %v4339_v28, %s3352_s28  ;;  %p3244_p5 = pnand %p3243_p7, %p4687_p11 }
 0x4d3   : > { %1934 = vrot.lane.b32.xlu0 %v4343_v61, %s3349_s27 }
 0x4d4   : > { %p3245_p9 = pneg %p3244_p5 }
 0x4d6   : > { %2096 = vrot.lane.b32.xlu1 %v4216_v30, %s3352_s28 }
 0x4d7   : > { %2050 = vrot.lane.b32.xlu0 %v4321_v49, %s3351_s22  ;;  %s4686_s22 = sld [smem:[#allocation31_spill]] }
 0x4da   : > { %2104 = vrot.lane.b32.xlu1 %v4216_v30, %s3352_s28 }
 0x4db   : > { %1942 = vrot.lane.b32.xlu0 %v4339_v28, %s3349_s27 }
 0x4de   : > { %2142 = vrot.lane.b32.xlu1 %v4287_v38, %s3353_s23  ;;  %v1929_v38 = vpop.permute.xlu1 %1928 }
 0x4df   : > { %2100 = vrot.lane.b32.xlu0 %v4321_v49, %s3352_s28  ;;  %s4592_s28 = scalar_lea.hbm %s4686_s22, %s2784_s4 }
 0x4e2   : > { %2140 = vrot.lane.b32.xlu1 %v4281_v32, %s3353_s23  ;;  %v2229_v32 = vld [vmem:[#allocation19] sm:$0x7]  ;;  %v1997_v45 = vpop.permute.xlu1 %1996 }
 0x4e3   : > { %2144 = vrot.lane.b32.xlu0 %v4343_v61, %s3353_s23 }
 0x4e6   : > { %2150 = vrot.lane.b32.xlu1 %v4321_v49, %s3353_s23 }
 0x4e7   : > { %2146 = vrot.lane.b32.xlu0 %v4216_v30, %s3353_s23 }
 0x4ea   : > { %2148 = vrot.lane.b32.xlu1 %v4315_v48, %s3353_s23 }
 0x4eb   : > { %2152 = vrot.lane.b32.xlu0 %v4339_v28, %s3353_s23 }
 0x4ee   : > { %2232 = vperm.xlu1 %2928, %v2229_v32  }
 0x4ef   : > { %2154 = vrot.lane.b32.xlu0 %v4216_v30, %s3353_s23  ;;  %s3246_s23 = sshll.u32 %s3359_s11, 4  ;;  %s3247_s23 = int_to_ptr.vmem [resolvable:$false] %s3246_s23 }
 0x4f0   : > { %s3248_s14 = scalar_lea.vmem %s3247_s23, 384  ;;  %p3249_p0 = scmp.lt.s32.totalorder %s4594_s25, %s3247_s23 }
 0x4f1   : > { %p3250_p6 = scmp.lt.s32.totalorder %s3248_s14, %s3242_s20 }
 0x4f3   : > { %p3251_p12 = por %p3250_p6, %p3249_p0 }
 0x4f4   : > { %v1793_v49 = vpop.permute.xlu1 %1792 }
 0x4f5   : > { %v1835_v56 = vpop.permute.xlu0 %1834  ;;  %p3252_p8 = pnand %p3251_p12, %p3245_p9 }
 0x4f8   : > { %v4473_v12 = vpop.permute.xlu1 %2002 }
 0x4f9   : > { %v1991_v57 = vpop.permute.xlu0 %1990 }
 0x4fc   : > { %v1785_v20 = vpop.permute.xlu1 %1784 }
 0x4fd   : > { %v1783_v59 = vpop.permute.xlu0 %1782 }
 0x4fe   : > { %v1796_v48 = vsel %vm549_vm1, %v1783_v59, %v1785_v20 }
 0x4ff   : > { %1808 = vst [vmem:[#allocation3 + $0x10] sm:$0xff] %v1796_v48  ;;  %2702 = vmatpush3.bf16.msra.mxu0 %v1796_v48 }
 0x500   : > { %v1995_v26 = vpop.permute.xlu1 %1994  ;;  %2973 = vmatprep.subr.msk.bf16.mxu0 %vm3979_vm14, %v2972_v63 }
 0x501   : > { %v2008_v6 = vsel %vm671_vm5, %v1995_v26, %v1997_v45  ;;  %v1833_v23 = vpop.permute.xlu0 %1832 }
 0x502   : > { %v1846_v31 = vsel %vm579_vm2, %v1833_v23, %v1835_v56 }
 0x503   : > { %1858 = vst [vmem:[#allocation3 + $0x40] sm:$0xff] %v1846_v31 }
 0x504   : > { %v1781_v33 = vpop.permute.xlu1 %1780 }
 0x505   : > { %v1794_v27 = vsel %vm549_vm1, %v1779_v11, %v1781_v33  ;;  %v1795_v14 = vsel %vm549_vm1, %v1781_v33, %v1783_v59  ;;  %v4486_v4 = vpop.permute.xlu0 %1882 }
 0x506   : > { %1806 = vst [vmem:[#allocation3] sm:$0xff] %v1794_v27  ;;  %1807 = vst [vmem:[#allocation3 + $0x8] sm:$0xff] %v1795_v14  ;;  %2257 = vmatprep.subr.bf16.mxu1 %v1795_v14 }
 0x507   : > { %2258 = vmatpush1.bf16.msra.mxu1 %v1794_v27 }
 0x508   : > { %v1831_v58 = vpop.permute.xlu1 %1830 }
 0x509   : > { %v1844_v15 = vsel %vm579_vm2, %v1829_v1, %v1831_v58  ;;  %v1845_v9 = vsel %vm579_vm2, %v1831_v58, %v1833_v23  ;;  %v4490_v21 = vpop.permute.xlu0 %1932 }
 0x50a   : > { %1856 = vst [vmem:[#allocation3 + $0x30] sm:$0xff] %v1844_v15  ;;  %1857 = vst [vmem:[#allocation3 + $0x38] sm:$0xff] %v1845_v9 }
 0x50c   : > { %v1881_v34 = vpop.permute.xlu1 %1880 }
 0x50d   : > { %v1894_v0 = vsel %vm605_vm3, %v1879_v24, %v1881_v34  ;;  %v1895_v28 = vsel %vm605_vm3, %v1881_v34, %v4486_v4  ;;  %v1993_v35 = vpop.permute.xlu0 %1992 }
 0x50e   : > { %1906 = vst [vmem:[#allocation3 + $0x60] sm:$0xff] %v1894_v0  ;;  %1907 = vst [vmem:[#allocation3 + $0x68] sm:$0xff] %v1895_v28  ;;  %v4496_v61 = vsel %vm671_vm5, %v1991_v57, %v1993_v35  ;;  %v4499_v29 = vsel %vm671_vm5, %v1993_v35, %v1995_v26 }
 0x510   : > { %v1931_v60 = vpop.permute.xlu1 %1930 }
 0x511   : > { %v1944_v36 = vsel %vm635_vm4, %v1929_v38, %v1931_v60  ;;  %v1945_v42 = vsel %vm635_vm4, %v1931_v60, %v4490_v21  ;;  %v1789_v43 = vpop.permute.xlu0 %1788 }
 0x512   : > { %v1797_v40 = vsel %vm549_vm1, %v4445_v17, %v1789_v43 }
 0x513   : > { %1809 = vst [vmem:[#allocation3 + $0x18] sm:$0xff] %v1797_v40 }
 0x514   : > { %v1791_v46 = vpop.permute.xlu1 %1790 }
 0x515   : > { %v1798_v11 = vsel %vm549_vm1, %v1789_v43, %v1791_v46  ;;  %v1799_v1 = vsel %vm549_vm1, %v1791_v46, %v1793_v49  ;;  %v1839_v50 = vpop.permute.xlu0 %1838  ;;  %v3355_v46 = vmov 0.0   ;;  %vm3356_vm1 = vmmov 0  }
 0x516   : > { %1810 = vst [vmem:[#allocation3 + $0x20] sm:$0xff] %v1798_v11  ;;  %1811 = vst [vmem:[#allocation3 + $0x28] sm:$0xff] %v1799_v1  ;;  %v1847_v24 = vsel %vm579_vm2, %v4457_v52, %v1839_v50  ;;  %2259 = vmatprep.subr.bf16.mxu1 %v1798_v11  ;;  %2704 = vmatpush3.bf16.msra.mxu0 %v1799_v1 }
 0x517   : > { %1859 = vst [vmem:[#allocation3 + $0x48] sm:$0xff] %v1847_v24  ;;  %2260 = vmatpush1.bf16.msra.mxu1 %v1797_v40  ;;  %2705 = vmatprep.subr.bf16.mxu0 %v2008_v6 }
 0x518   : > { %v2043_v38 = vpop.permute.xlu1 %2042  ;;  %2261 = vmatprep.subr.bf16.mxu1 %v1845_v9 }
 0x519   : > { %v1889_v17 = vpop.permute.xlu0 %1888 }
 0x51a   : > { %v1897_v32 = vsel %vm605_vm3, %v4463_v53, %v1889_v17  ;;  %2706 = vmatpush3.bf16.msra.mxu0 %v1846_v31 }
 0x51b   : > { %2262 = vmatpush1.bf16.msra.mxu1 %v1844_v15  ;;  %v2975_v15 = vpack.c.bf16 %v1730_v19, %v1727_v10  ;;  %v2981_v10 = vpack.c.bf16 %v1736_v54, %v1733_v2 }
 0x51c   : > { %v1841_v45 = vpop.permute.xlu1 %1840 }
 0x51d   : > { %v1848_v49 = vsel %vm579_vm2, %v1839_v50, %v1841_v45  ;;  %v1939_v56 = vpop.permute.xlu0 %1938 }
 0x51e   : > { %1860 = vst [vmem:[#allocation3 + $0x50] sm:$0xff] %v1848_v49  ;;  %v1947_v52 = vsel %vm635_vm4, %v4471_v55, %v1939_v56  ;;  %2263 = vmatprep.subr.bf16.mxu1 %v1848_v49 }
 0x51f   : > { %2264 = vmatpush1.bf16.msra.mxu1 %v1847_v24 }
 0x520   : > { %v2041_v57 = vpop.permute.xlu1 %2040  ;;  %2265 = vmatprep.subr.bf16.mxu1 %v1895_v28 }
 0x521   : > { %v4516_v20 = vsel %vm697_vm6, %v2041_v57, %v2043_v38  ;;  %v1999_v59 = vpop.permute.xlu0 %1998 }
 0x523   : > { %2266 = vmatpush1.bf16.msra.mxu1 %v1894_v0  ;;  %v2978_v0 = vpack.c.bf16 %v1729_v16, %v1726_v7 }
 0x524   : > { %v1891_v53 = vpop.permute.xlu1 %1890 }
 0x525   : > { %v1898_v48 = vsel %vm605_vm3, %v1889_v17, %v1891_v53  ;;  %v2045_v26 = vpop.permute.xlu0 %2044 }
 0x526   : > { %v2057_v63 = vsel %vm697_vm6, %v2043_v38, %v2045_v26  ;;  %2267 = vmatprep.subr.bf16.mxu1 %v1898_v48 }
 0x527   : > { %2268 = vmatpush1.bf16.msra.mxu1 %v1897_v32 }
 0x528   : > { %v1843_v6 = vpop.permute.xlu1 %1842  ;;  %2269 = vmatprep.subr.bf16.mxu1 %v1945_v42 }
 0x529   : > { %v1849_v55 = vsel %vm579_vm2, %v1841_v45, %v1843_v6  ;;  %v2005_v23 = vpop.permute.xlu0 %2004 }
 0x52a   : > { %1861 = vst [vmem:[#allocation3 + $0x58] sm:$0xff] %v1849_v55  ;;  %v2011_v31 = vsel %vm671_vm5, %v4473_v12, %v2005_v23 }
 0x52b   : > { %2270 = vmatpush1.bf16.msra.mxu1 %v1944_v36  ;;  %2707 = vmatprep.subr.bf16.mxu0 %v2011_v31 }
 0x52c   : > { %v1941_v33 = vpop.permute.xlu1 %1940  ;;  %2708 = vmatpush3.bf16.msra.mxu0 %v1849_v55 }
 0x52d   : > { %v1948_v27 = vsel %vm635_vm4, %v1939_v56, %v1941_v33  ;;  %v2049_v14 = vpop.permute.xlu0 %2048 }
 0x52e   : > { %2271 = vmatprep.subr.bf16.mxu1 %v1948_v27 }
 0x52f   : > { %2272 = vmatpush1.bf16.msra.mxu1 %v1947_v52 }
 0x530   : > { %v2053_v58 = vpop.permute.xlu1 %2052  ;;  %2976 = vmatprep.subr.msk.bf16.mxu1 %vm4126_vm15, %v2975_v15 }
 0x531   : > { %v1885_v9 = vpop.permute.xlu0 %1884 }
 0x532   : > { %v1896_v34 = vsel %vm605_vm3, %v4486_v4, %v1885_v9 }
 0x533   : > { %1908 = vst [vmem:[#allocation3 + $0x70] sm:$0xff] %v1896_v34  ;;  %2979 = vmatpush1.bf16.msk.msra.mxu1 %vm4141_vm0, %v2978_v0 }
 0x534   : > { %v2047_v5 = vpop.permute.xlu1 %2046  ;;  %2982 = vmatprep.subr.msk.bf16.mxu1 %vm4126_vm15, %v2981_v10  ;;  %v2427_v10 = vstv %s2424_s10 }
 0x535   : > { %v2058_v13 = vsel %vm697_vm6, %v2045_v26, %v2047_v5  ;;  %v2095_v19 = vpop.permute.xlu0 %2094 }
 0x536   : > { %2709 = vmatprep.subr.bf16.mxu0 %v2058_v13 }
 0x537   : > { %2985 = vmatpush1.bf16.msk.msra.mxu1 %vm4141_vm0, %v2984_v62  ;;  %2710 = vmatpush3.bf16.msra.mxu0 %v1896_v34 }
 0x538   : > { %v2093_v7 = vpop.permute.xlu1 %2092  ;;  %2277 = vmatprep.subr.bf16.mxu1 %v4499_v29 }
 0x539   : > { %v2107_v8 = vsel %vm727_vm7, %v2093_v7, %v2095_v19  ;;  %v2055_v37 = vpop.permute.xlu0 %2054 }
 0x53a   : > { %v2061_v16 = vsel %vm697_vm6, %v2053_v58, %v2055_v37  ;;  %v2425_v37 = vld [vmem:[%s440_s29] sm:$0x77] }
 0x53b   : > { %2278 = vmatpush1.bf16.msra.mxu1 %v4496_v61  ;;  %2711 = vmatprep.subr.bf16.mxu0 %v2061_v16  ;;  %v2426_v16 = vld [vmem:[%s440_s29 + $0x8] sm:$0x7]  ;;  %s2444_s29 = scalar_lea.sflag [#allocation7], %s3718_s1 }
 0x53c   : > { %v2091_v47 = vpop.permute.xlu1 %2090 }
 0x53d   : > { %v2106_v22 = vsel %vm727_vm7, %v2091_v47, %v2093_v7  ;;  %v2099_v25 = vpop.permute.xlu0 %2098 }
 0x540   : > { %v1893_v18 = vpop.permute.xlu1 %1892 }
 0x541   : > { %v1899_v41 = vsel %vm605_vm3, %v1891_v53, %v1893_v18  ;;  %v2001_v2 = vpop.permute.xlu0 %2000 }
 0x542   : > { %v2009_v3 = vsel %vm671_vm5, %v1999_v59, %v2001_v2  ;;  %v2010_v44 = vsel %vm671_vm5, %v2001_v2, %v4473_v12  ;;  %2712 = vmatpush3.bf16.msra.mxu0 %v1899_v41 }
 0x543   : > { %2279 = vmatprep.subr.bf16.mxu1 %v2010_v44 }
 0x544   : > { %v2103_v54 = vpop.permute.xlu1 %2102  ;;  %2280 = vmatpush1.bf16.msra.mxu1 %v2009_v3 }
 0x545   : > { %v1935_v4 = vpop.permute.xlu0 %1934  ;;  %2281 = vmatprep.subr.bf16.mxu1 %v2057_v63 }
 0x546   : > { %v1946_v28 = vsel %vm635_vm4, %v4490_v21, %v1935_v4 }
 0x548   : > { %v2097_v35 = vpop.permute.xlu1 %2096  ;;  %2282 = vmatpush1.bf16.msra.mxu1 %v4516_v20 }
 0x549   : > { %v2108_v61 = vsel %vm727_vm7, %v2095_v19, %v2097_v35  ;;  %v2051_v29 = vpop.permute.xlu0 %2050 }
 0x54a   : > { %v2059_v60 = vsel %vm697_vm6, %v2049_v14, %v2051_v29  ;;  %v2060_v36 = vsel %vm697_vm6, %v2051_v29, %v2053_v58  ;;  %2713 = vmatprep.subr.bf16.mxu0 %v2108_v61 }
 0x54b   : > { %2283 = vmatprep.subr.bf16.mxu1 %v2060_v36  ;;  %2714 = vmatpush3.bf16.msra.mxu0 %v1946_v28 }
 0x54c   : > { %v2105_v12 = vpop.permute.xlu1 %2104  ;;  %2284 = vmatpush1.bf16.msra.mxu1 %v2059_v60 }
 0x54d   : > { %v2111_v42 = vsel %vm727_vm7, %v2103_v54, %v2105_v12  ;;  %v1943_v43 = vpop.permute.xlu0 %1942  ;;  %2285 = vmatprep.subr.bf16.mxu1 %v2107_v8 }
 0x54e   : > { %v1949_v21 = vsel %vm635_vm4, %v1941_v33, %v1943_v43  ;;  %2715 = vmatprep.subr.bf16.mxu0 %v2111_v42 }
 0x54f   : > { %2716 = vmatpush3.bf16.msra.mxu0 %v1949_v21 }
 0x550   : > { %v2143_v40 = vpop.permute.xlu1 %2142  ;;  %2286 = vmatpush1.bf16.msra.mxu1 %v2106_v22  ;;  %2748 = vmatprep.subr.bf16.mxu0 %v3355_v46 }
 0x551   : > { %v2101_v11 = vpop.permute.xlu0 %2100 }
 0x552   : > { %v2109_v1 = vsel %vm727_vm7, %v2099_v25, %v2101_v11  ;;  %v2110_v50 = vsel %vm727_vm7, %v2101_v11, %v2103_v54  ;;  %2372 = vmatmul.mubr.bf16.vlgmr.msra.gmra.mrb[16].mxu0 %v4427_v39 }
 0x553   : > { %2287 = vmatprep.subr.bf16.mxu1 %v2110_v50  ;;  %2752 = vmatprep.mubr.msk.bf16.mxu0 %vm3356_vm1, %v3355_v46 }
 0x554   : > { %v2141_v24 = vpop.permute.xlu1 %2140  ;;  %2288 = vmatpush1.bf16.msra.mxu1 %v2109_v1 }
 0x555   : > { %v2156_v38 = vsel %vm753_vm8, %v2141_v24, %v2143_v40  ;;  %v2145_v17 = vpop.permute.xlu0 %2144 }
 0x556   : > { %v2157_v32 = vsel %vm753_vm8, %v2143_v40, %v2145_v17 }
 0x557   : > { %2290 = vmatmul.mubr.bf16.vlgmr.msra.gmra.mrb[16].mxu1 %v4427_v39  ;;  %2298 = vmatprep.subr.bf16.mxu1 %v2157_v32 }
 0x558   : > { %v2151_v45 = vpop.permute.xlu1 %2150  ;;  %2299 = vmatpush1.bf16.msra.mxu1 %v2156_v38  ;;  %2330 = vmatprep.mubr.bf16.mxu1 %v4216_v30 }
 0x559   : > { %v2147_v49 = vpop.permute.xlu0 %2146 }
 0x55a   : > { %v2158_v56 = vsel %vm753_vm8, %v2145_v17, %v2147_v49 }
 0x55b   : > { %2749 = vmatpush3.bf16.msra.mxu0 %v2158_v56 }
 0x55c   : > { %v2149_v52 = vpop.permute.xlu1 %2148  ;;  %2750 = vmatprep.subr.bf16.mxu0 %v3355_v46 }
 0x55d   : > { %v2159_v57 = vsel %vm753_vm8, %v2149_v52, %v2151_v45  ;;  %v2153_v20 = vpop.permute.xlu0 %2152 }
 0x55e   : > { %v2160_v59 = vsel %vm753_vm8, %v2151_v45, %v2153_v20 }
 0x55f   : > { %2300 = vmatprep.subr.bf16.mxu1 %v2160_v59 }
 0x560   : > { %2301 = vmatpush1.bf16.msra.mxu1 %v2159_v57 }
 0x561   : > { %v2155_v53 = vpop.permute.xlu0 %2154 }
 0x562   : > { %v2161_v39 = vsel %vm753_vm8, %v2153_v20, %v2155_v53 }
 0x563   : > { %2657 = vmatmul.mubr.msk.bf16.vlgmr.msra.gmra.mrb[16].mxu1 %vm1515_vm9, %v4453_v51  ;;  %2751 = vmatpush3.bf16.msra.mxu0 %v2161_v39 }
 0x566   : > { %2753 = vmatmul.mubr.msk.bf16.vlgmr.msra.gmra.mrb[20].mxu0 %vm1515_vm9, %v4453_v51 }
 0x56d   : > { %v2233_v55 = vpop.permute.xlu1 %2232 }
 0x625   : > { %v2717_v30 = vpop.f32.mrb[16].mxu0 }
 0x626   : > { %v2718_v48 = vpop.f32.mrb[17].mxu0 }
 0x627   : > { %v2719_v26 = vadd.f32 %v2718_v48, %v2717_v30  ;;  %v2720_v63 = vpop.f32.mrb[18].mxu0 }
 0x628   : > { %v2721_v6 = vpop.f32.mrb[19].mxu0 }
 0x629   : > { %v2374_v58 = vadd.f32 %v2719_v26, %v2233_v55 }
 0x636   : > { %v2332_v23 = vpop.f32.mrb[16].mxu1 }
 0x637   : > { %v2764_v31 = vadd.f32 %v2332_v23, %v2233_v55  ;;  %v2334_v33 = vpop.f32.mrb[17].mxu1 }
 0x638   : > { %v2765_v27 = vadd.f32 %v2334_v33, %v2233_v55  ;;  %v2336_v14 = vpop.f32.mrb[18].mxu1 }
 0x639   : > { %2943 = vtanh.f32 %v2764_v31  ;;  %v2337_v15 = vpop.f32.mrb[19].mxu1  ;;  %v2413_v9 = vpop.f32.mrb[20].mxu0 }
 0x63a   : > { %2945 = vtanh.f32 %v2765_v27  ;;  %v2414_v34 = vadd.f32 %v2413_v9, %v2374_v58  ;;  %v2754_v51 = vpop.f32.mrb[21].mxu0 }
 0x63b   : > { %v2416_v0 = vpop.f32.mrb[22].mxu0 }
 0x63c   : > { %2947 = vtanh.f32 %v2414_v34  ;;  %v2755_v5 = vpop.f32.mrb[23].mxu0 }
 0x643   : > { %v2944_v13 = vpop.eup %2943 }
 0x644   : > { %v2946_v19 = vpop.eup %2945  ;;  %v2428_v62 = vmul.f32 %v2944_v13, %v2427_v10 }
 0x645   : > { %v2429_v7 = vmul.f32 %v2946_v19, %v2427_v10 }
 0x646   : > { %v2948_v8 = vpop.eup %2947 }
 0x647   : > { %v2433_v47 = vcombine.low %v2428_v62, %v2429_v7  ;;  %v2430_v22 = vmul.f32 %v2948_v8, %v2427_v10 }
 0x649   : > { %v2435_v25 = vadd.f32 %v2433_v47, %v2425_v37  ;;  %v2436_v18 = vadd.f32 %v2430_v22, %v2426_v16 }
 0x64b   : > { %v2437_v41 = vmax.f32 %v2435_v25, 0.0  ;;  %v2438_v2 = vmax.f32 %v2436_v18, 0.0 }
 0x64d   : > { %v2439_v3 = vmin.f32 %v2437_v41, 1.0  ;;  %v2440_v44 = vmin.f32 %v2438_v2, 1.0 }
 0x64f   : > { %2441 = vst [vmem:[%s509_s30] sm:$0x77] %v2439_v3  ;;  %2442 = vst [vmem:[%s509_s30 + $0x8] sm:$0x7] %v2440_v44 }
 0x650   : > { %3255 = shalt.err (!%p3252_p8)
}
 0x651   : > { %s3256_s1 = scalar_lea.hbm %s4592_s28, 192  ;;  %s3260_s21 = scalar_lea.hbm %s4686_s22, 384 }
 0x652   : > { %p3257_p10 = scmp.ne.s32.totalorder %s4592_s28, %s3256_s1  ;;  %p3261_p1 = scmp.lt.u32.totalorder %s4592_s28, %s4686_s22 }
 0x653   : > { %p3262_p3 = scmp.lt.u32.totalorder %s3260_s21, %s3256_s1  ;;  %p3264_p7 = scmp.lt.u32.totalorder %s3256_s1, %s4592_s28 }
 0x654   : > { %p3258_p4 = pnand %p3257_p10, %p4687_p11 }
 0x655   : > { %p3263_p2 = por %p3262_p3, %p3261_p1 }
 0x656   : > { %p3259_p13 = pneg %p3258_p4 }
 0x657   : > { %p3265_p5 = por %p3264_p7, %p3263_p2 }
 0x659   : > { %p3266_p9 = pnand %p3265_p5, %p3259_p13 }
 0x65b   : > { %3269 = shalt.err (!%p3266_p9)
}
 0x65c   : > { %2817 = dma.vmem_to_hbm [thread:$0]  (%p4687_p11), %s4594_s25, 192, %s4592_s28, %s2444_s29  }
 0x65d PF: > { %s2470_s30 = sand.u32 1, %s3316_s15   ;;  %p4688_p0 = scmp.ne.s32.totalorder %s4665_s26, 0 }
 0x65e   : > { %p4689_p6 = scmp.ge.s32.totalorder %s3328_s18, 2  ;;  %s2471_s27 = scalar_lea.sflag [#allocation7], %s2470_s30 }
 0x660   : > { %p2849_p12 = pnand %p4689_p6, %p4688_p0 }
 0x662   : > { %3311 = dma.done.wait (!%p2849_p12), %s2471_s27, 192  }
 0x663   : > { %3313 = vsyncadd (!%p2849_p12), %s2471_s27, 4294967104  ;;  %p30_p8 = scmp.ge.s32.totalorder %s3613_s24, 4   ;;  %s4690_s15 = smov %s3320_s16 }
 0x664   : > { %s4691_s16 = smov %s3324_s17  ;;  %s4692_s17 = smov %s3625_s13 }
 0x665   : > { %s4693_s18 = smov %s3613_s24  ;;  %32 = sbr.rel (!%p30_p8) target bundleno = 16 (0x10), region = 146 }
 0x66c   :  { %2476 = vsyncpa [#allocation6], 1 }
 0x66d   :  { %2478 = vsyncpa [#allocation6 + $0x1], 1 }
 0x66e   :  { %2479 = vsyncpa [#allocation9], 1 }
 0x66f   :  { %2481 = vsyncpa [#allocation9 + $0x1], 1 }
 0x670   :  { %2482 = vsyncpa [#allocation12], 1 }
 0x671   :  { %2483 = vsyncpa [#allocation15], 1 }
 0x672   :  { %2484 = vsyncpa [#allocation18], 1 }
 0x673   :  { %2485 = vsyncpa [#allocation7], 1 }
 0x674   :  { %2487 = vsyncpa [#allocation7 + $0x1], 1 }

</bundles_post_ra>
